<compile_context>
chip_gen: v6e
topology: v6e:2x2x1
jax: 0.10.0
libtpu: 0.0.40
codegen_flags: <defaults>
</compile_context>

<pallas_src>
import numpy as np
import jax
import jax.numpy as jnp
from jax import lax
from jax.experimental import pallas as pl
from jax.experimental.pallas import tpu as pltpu

# ----------------------- model dimensions (small, synthetic) -----------------
B, S = 2, 4            # batch, sequence
H = 32                 # hidden_size
I = 64                 # moe_intermediate_size
E = 8                  # number of routed experts
TOPK = 2               # num_experts_per_tok
GROUP = 4              # group_size == n_fused experts per fused expert
G = E // GROUP         # number of fused (merged) experts
RANK = 8               # low-rank adapter rank
N_SHARED = 1           # config.n_shared_experts
IS = I * N_SHARED      # shared-expert intermediate size
T = B * S              # number of tokens (single row tile: L1 stats stay global)

RP = RANK              # no rank padding: adapter intermediates never leave vregs
GRP = GROUP * RP       # 32 adapter columns per projection


# ------------------------------- Pallas kernel --------------------------------
def fused_moe_kernel(x_ref, tkw_ref, tkwgu_ref, tkwd_ref, scal_ref,
                     wmask_ref, wgu_ref, qagu_ref, qbgu_ref,
                     wd_ref, qad_ref, qbd_ref,
                     wgus_ref, wds_ref, o_ref):
    """Single grid step: shared-experts MLP + an unrolled loop over the G fused
    groups, accumulated in f32 vregs, one final store to o_ref."""
    x = x_ref[...]                                      # (T, H) f32
    xb0 = x.astype(jnp.bfloat16)

    # ---- shared experts (accumulator init) -----------------------------------
    gu_s = jnp.dot(xb0, wgus_ref[...], preferred_element_type=jnp.float32)   # (T, 2*IS)
    g_s, u_s = gu_s[:, :IS], gu_s[:, IS:]
    h_s = (g_s * jax.nn.sigmoid(g_s)) * u_s                                  # f32 SiLU
    acc = jnp.dot(h_s.astype(jnp.bfloat16), wds_ref[...],
                  preferred_element_type=jnp.float32)                        # (T, H)

    # ---- fused (merged) experts, unrolled over the G groups ------------------
    for g in range(G):
        tkw = tkw_ref[g]                                # (T, GROUP) group-softmax weights
        scal = scal_ref[g]                              # (T, 1) sum of routed top-k weights
        wmask = wmask_ref[g]                            # (GROUP, H)
        # NOTE: exact float-zero test matches the reference module's routing mask.
        m = (scal != 0.0).astype(jnp.float32)           # (T, 1) routed-token mask
        cnt = jnp.maximum(jnp.sum(m), 1.0)

        # FusedMLP: x = x + mask_up_proj(top_k_weights)  -- K=GROUP weighted sum on VPU
        xm = x
        for k in range(GROUP):
            xm = xm + tkw[:, k:k + 1] * wmask[k:k + 1, :]
        xb = xm.astype(jnp.bfloat16)

        # fused gate+up projection (base + mixture adapter, one adapter pair)
        base_gu = jnp.dot(xb, wgu_ref[g], preferred_element_type=jnp.float32)   # (T, 2*I)
        a_gu = jnp.dot(xb, qagu_ref[g], preferred_element_type=jnp.float32)     # (T, 2*GRP)
        a_gu = a_gu * tkwgu_ref[g]                      # per-expert mixture weights (VPU)
        # NOTE: bf16 cast after the f32 mixture scaling is a deliberate precision point.
        adpt_gu = jnp.dot(a_gu.astype(jnp.bfloat16), qbgu_ref[g],
                          preferred_element_type=jnp.float32)                   # (T, 2*I)
        # first_forward scaling: per-feature L1 ratio over routed rows only (f32)
        l1 = jnp.sum(jnp.abs(base_gu) * m, axis=0, keepdims=True) / cnt
        al1 = jnp.sum(jnp.abs(adpt_gu) * m, axis=0, keepdims=True) / cnt
        gu = base_gu + (l1 / (al1 + 1e-8)) * adpt_gu
        g_part, u_part = gu[:, :I], gu[:, I:]
        h = (g_part * jax.nn.sigmoid(g_part)) * u_part                          # SiLU in f32
        hb = h.astype(jnp.bfloat16)

        # down projection (base + mixture adapter)
        base_d = jnp.dot(hb, wd_ref[g], preferred_element_type=jnp.float32)     # (T, H)
        a_d = jnp.dot(hb, qad_ref[g], preferred_element_type=jnp.float32)       # (T, GRP)
        a_d = a_d * tkwd_ref[g]
        adpt_d = jnp.dot(a_d.astype(jnp.bfloat16), qbd_ref[g],
                         preferred_element_type=jnp.float32)                    # (T, H)
        l1d = jnp.sum(jnp.abs(base_d) * m, axis=0, keepdims=True) / cnt
        al1d = jnp.sum(jnp.abs(adpt_d) * m, axis=0, keepdims=True) / cnt
        d = base_d + (l1d / (al1d + 1e-8)) * adpt_d

        acc = acc + scal * d                            # routed-weight scalar per token

    o_ref[...] = acc                                    # single store


# ------------------------------- pallas_call wrapper ---------------------------
def run_fused_moe(hs, tkw_g, tkw_gu, tkw_d, scal_g, p):
    operands = (hs, tkw_g, tkw_gu, tkw_d, scal_g,
                p["wmask"], p["wgu"], p["qa_gu"], p["qb_gu"],
                p["wd"], p["qa_d"], p["qb_d"], p["wgu_s"], p["wd_s"])

    def full_spec(a):
        nd = a.ndim
        return pl.BlockSpec(a.shape, lambda i, _nd=nd: (0,) * _nd)

    return pl.pallas_call(
        fused_moe_kernel,
        out_shape=jax.ShapeDtypeStruct((T, H), jnp.float32),
        grid=(1,),                                      # single step: G collapsed in-kernel
        in_specs=[full_spec(a) for a in operands],
        out_specs=pl.BlockSpec((T, H), lambda i: (0, 0)),
        compiler_params=pltpu.CompilerParams(
            dimension_semantics=("arbitrary",)),
    )(*operands)


# ------------------------------- routing glue (plain JAX) ----------------------
def moe_gate(hs, w_gate):
    logits = hs @ w_gate.T
    scores = jax.nn.softmax(logits, axis=-1)
    topk_weight, topk_idx = lax.top_k(scores, TOPK)
    return topk_idx, topk_weight


def group_routing(topk_idx, topk_weight, inv_mapping):
    tkw_g, scal_g = [], []
    for idx in range(G):
        members = inv_mapping[idx]                                     # (GROUP,)
        hit = (topk_idx[:, :, None] == members[None, None, :])         # (T, TOPK, GROUP)
        flat = jnp.sum(topk_weight[:, :, None] * hit, axis=1)          # (T, GROUP)
        scalar = jnp.sum(flat, axis=-1, keepdims=True)                 # (T, 1)
        sm = jax.nn.softmax(jnp.where(flat == 0.0, -1e9, flat), axis=-1)
        tkw_g.append(sm)
        scal_g.append(scalar)
    return jnp.stack(tkw_g), jnp.stack(scal_g)


@jax.jit
def fused_moe_forward(x, packed):
    orig_shape = x.shape
    hs = x.reshape(-1, x.shape[-1])                                    # (T, H) f32
    topk_idx, topk_weight = moe_gate(hs, packed["w_gate"])
    tkw_g, scal_g = group_routing(topk_idx, topk_weight, packed["inv_mapping"])
    # per-expert mixture weights repeated per adapter column block (tiny glue)
    tkw_d = jnp.repeat(tkw_g, RP, axis=-1)                             # (G, T, GRP)
    tkw_gu = jnp.tile(tkw_d, (1, 1, 2))                                # (G, T, 2*GRP)
    y = run_fused_moe(hs, tkw_g, tkw_gu, tkw_d, scal_g, packed)        # (T, H) incl. shared
    return y.reshape(orig_shape)


# ------------------------------- parameter init / packing ----------------------
def init_params(key):
    ks = jax.random.split(key, 14)
    n = lambda k, shape: 0.02 * jax.random.normal(k, shape, dtype=jnp.float32)
    return dict(
        w_gate=n(ks[0], (E, H)),
        inv_mapping=jnp.arange(E, dtype=jnp.int32).reshape(G, GROUP),
        w_mask=n(ks[1], (G, H, GROUP)),                 # mask_up_proj (out=H, in=GROUP)
        gate_w=n(ks[2], (G, I, H)),
        gate_qa=n(ks[3], (G, GROUP, RANK, H)),
        gate_qb=n(ks[4], (G, GROUP, I, RANK)),
        up_w=n(ks[5], (G, I, H)),
        up_qa=n(ks[6], (G, GROUP, RANK, H)),
        up_qb=n(ks[7], (G, GROUP, I, RANK)),
        down_w=n(ks[8], (G, H, I)),
        down_qa=n(ks[9], (G, GROUP, RANK, I)),
        down_qb=n(ks[10], (G, GROUP, H, RANK)),
        wg_s=n(ks[11], (IS, H)),
        wu_s=n(ks[12], (IS, H)),
        wd_s=n(ks[13], (H, IS)),
    )


def pack_params(r):
    """One-time repack: transpose to (in,out), fuse gate|up, concatenate the
    GROUP adapters along the rank axis, cast weights to bf16.  No zero padding
    except the structural block-diagonal of qb_gu."""
    bf16 = jnp.bfloat16
    sw = lambda a: jnp.swapaxes(a, -1, -2)

    wmask = sw(r["w_mask"])                             # (G, GROUP, H) f32, VPU path

    def qa_cat(qa):   # (G, GROUP, RANK, in) -> (G, in, GROUP*RANK)
        a = sw(qa)                                      # (G, GROUP, in, RANK)
        return jnp.transpose(a, (0, 2, 1, 3)).reshape(G, a.shape[2], GRP)

    def qb_cat(qb):   # (G, GROUP, out, RANK) -> (G, GROUP*RANK, out)
        b = sw(qb)                                      # (G, GROUP, RANK, out)
        return b.reshape(G, GRP, qb.shape[2])

    wgu = jnp.concatenate([sw(r["gate_w"]), sw(r["up_w"])], axis=-1).astype(bf16)   # (G,H,2I)
    qa_gu = jnp.concatenate([qa_cat(r["gate_qa"]),
                             qa_cat(r["up_qa"])], axis=-1).astype(bf16)             # (G,H,2GRP)
    qb_g, qb_u = qb_cat(r["gate_qb"]), qb_cat(r["up_qb"])                            # (G,GRP,I)
    qb_gu = (jnp.zeros((G, 2 * GRP, 2 * I), jnp.float32)
             .at[:, :GRP, :I].set(qb_g)
             .at[:, GRP:, I:].set(qb_u)).astype(bf16)                                # (G,2GRP,2I)

    wd = sw(r["down_w"]).astype(bf16)                   # (G, I, H)
    qa_d = qa_cat(r["down_qa"]).astype(bf16)            # (G, I, GRP)
    qb_d = qb_cat(r["down_qb"]).astype(bf16)            # (G, GRP, H)

    wgu_s = jnp.concatenate([r["wg_s"].T, r["wu_s"].T], axis=-1).astype(bf16)        # (H, 2*IS)
    wd_s = r["wd_s"].T.astype(bf16)                                                  # (IS, H)

    return dict(w_gate=r["w_gate"], inv_mapping=r["inv_mapping"],
                wmask=wmask, wgu=wgu, qa_gu=qa_gu, qb_gu=qb_gu,
                wd=wd, qa_d=qa_d, qb_d=qb_d, wgu_s=wgu_s, wd_s=wd_s)


# ------------------------------- numpy reference -------------------------------
def _np_softmax(x, axis=-1):
    x = x - x.max(axis=axis, keepdims=True)
    e = np.exp(x)
    return e / e.sum(axis=axis, keepdims=True)


def _np_silu(x):
    return x / (1.0 + np.exp(-x))


def _ref_fused_linear(x, tkw, w, qa, qb):
    base = x @ w.T
    xi = np.einsum('bh,krh->bkr', x, qa)
    xi = np.einsum('bkr,khr->bkh', xi, qb)
    adapter = np.sum(xi * tkw[:, :, None], axis=1)
    l1 = np.mean(np.abs(base), axis=0)
    al1 = np.mean(np.abs(adapter), axis=0)
    return base + (l1 / (al1 + 1e-8))[None] * adapter


def _ref_fused_mlp(x, tkw, p, idx):
    x = x + tkw @ p["w_mask"][idx].T
    g = _ref_fused_linear(x, tkw, p["gate_w"][idx], p["gate_qa"][idx], p["gate_qb"][idx])
    u = _ref_fused_linear(x, tkw, p["up_w"][idx], p["up_qa"][idx], p["up_qb"][idx])
    return _ref_fused_linear(_np_silu(g) * u, tkw,
                             p["down_w"][idx], p["down_qa"][idx], p["down_qb"][idx])


def ref_forward(x, topk_idx, topk_weight, p):
    hs = x.reshape(-1, x.shape[-1])
    y = np.zeros_like(hs)
    for idx in range(G):
        members = p["inv_mapping"][idx]
        hit = (topk_idx[:, :, None] == members[None, None, :])
        flat = np.sum(topk_weight[:, :, None] * hit, axis=1)
        scalar = flat.sum(-1, keepdims=True)
        sm = _np_softmax(np.where(flat == 0.0, -1e9, flat), axis=-1)
        sel = scalar[:, 0] != 0
        out = np.zeros_like(hs)
        if sel.any():
            out[sel] = _ref_fused_mlp(hs[sel], sm[sel], p, idx)
        y = y + scalar * out
    y = y.reshape(x.shape)
    g = hs @ p["wg_s"].T
    u = hs @ p["wu_s"].T
    shared = (_np_silu(g) * u) @ p["wd_s"].T
    return y + shared.reshape(x.shape)


# ------------------------------------ main --------------------------------------
if __name__ == "__main__":
    key = jax.random.PRNGKey(0)
    kx, kp = jax.random.split(key)
    x = jax.random.normal(kx, (B, S, H), dtype=jnp.float32)
    raw = init_params(kp)
    packed = pack_params(raw)

    y = jax.block_until_ready(fused_moe_forward(x, packed))

    # cross-check against a pure numpy reference mirroring the PyTorch module
    hs = np.asarray(x).reshape(-1, H)
    ti, tw = moe_gate(jnp.asarray(hs), raw["w_gate"])
    p_np = {k: np.asarray(v) for k, v in raw.items()}
    y_ref = ref_forward(np.asarray(x), np.asarray(ti), np.asarray(tw), p_np)

    assert y.shape == (B, S, H)
    # tolerance accounts for bf16 matmul inputs in the kernel (reference is f32)
    np.testing.assert_allclose(np.asarray(y), y_ref, rtol=5e-2, atol=5e-3)
    print("KERNEL_OK")
</pallas_src>

<mosaic_0001>
module attributes {stable_mosaic.version = 11 : i64} {
  func.func @fused_moe_kernel(%arg0: i32, %arg1: memref<8x32xf32, #tpu.memory_space<vmem>>, %arg2: memref<2x8x4xf32, #tpu.memory_space<vmem>>, %arg3: memref<2x8x64xf32, #tpu.memory_space<vmem>>, %arg4: memref<2x8x32xf32, #tpu.memory_space<vmem>>, %arg5: memref<2x8x1xf32, #tpu.memory_space<vmem>>, %arg6: memref<2x4x32xf32, #tpu.memory_space<vmem>>, %arg7: memref<2x32x128xbf16, #tpu.memory_space<vmem>>, %arg8: memref<2x32x64xbf16, #tpu.memory_space<vmem>>, %arg9: memref<2x64x128xbf16, #tpu.memory_space<vmem>>, %arg10: memref<2x64x32xbf16, #tpu.memory_space<vmem>>, %arg11: memref<2x64x32xbf16, #tpu.memory_space<vmem>>, %arg12: memref<2x32x32xbf16, #tpu.memory_space<vmem>>, %arg13: memref<32x128xbf16, #tpu.memory_space<vmem>>, %arg14: memref<64x32xbf16, #tpu.memory_space<vmem>>, %arg15: memref<8x32xf32, #tpu.memory_space<vmem>>) attributes {dimension_semantics = [#tpu.dimension_semantics<arbitrary>], iteration_bounds = array<i64: 1>, scalar_prefetch = 0 : i64, scratch_operands = 0 : i64, tpu.core_type = #tpu.core_type<tc>, window_params = [{pipeline_mode = #tpu.pipeline_mode<synchronous>, transform_indices = @transform_0, window_bounds = array<i64: 8, 32>}, {pipeline_mode = #tpu.pipeline_mode<synchronous>, transform_indices = @transform_1, window_bounds = array<i64: 2, 8, 4>}, {pipeline_mode = #tpu.pipeline_mode<synchronous>, transform_indices = @transform_2, window_bounds = array<i64: 2, 8, 64>}, {pipeline_mode = #tpu.pipeline_mode<synchronous>, transform_indices = @transform_3, window_bounds = array<i64: 2, 8, 32>}, {pipeline_mode = #tpu.pipeline_mode<synchronous>, transform_indices = @transform_4, window_bounds = array<i64: 2, 8, 1>}, {pipeline_mode = #tpu.pipeline_mode<synchronous>, transform_indices = @transform_5, window_bounds = array<i64: 2, 4, 32>}, {pipeline_mode = #tpu.pipeline_mode<synchronous>, transform_indices = @transform_6, window_bounds = array<i64: 2, 32, 128>}, {pipeline_mode = #tpu.pipeline_mode<synchronous>, transform_indices = @transform_7, window_bounds = array<i64: 2, 32, 64>}, {pipeline_mode = #tpu.pipeline_mode<synchronous>, transform_indices = @transform_8, window_bounds = array<i64: 2, 64, 128>}, {pipeline_mode = #tpu.pipeline_mode<synchronous>, transform_indices = @transform_9, window_bounds = array<i64: 2, 64, 32>}, {pipeline_mode = #tpu.pipeline_mode<synchronous>, transform_indices = @transform_10, window_bounds = array<i64: 2, 64, 32>}, {pipeline_mode = #tpu.pipeline_mode<synchronous>, transform_indices = @transform_11, window_bounds = array<i64: 2, 32, 32>}, {pipeline_mode = #tpu.pipeline_mode<synchronous>, transform_indices = @transform_12, window_bounds = array<i64: 32, 128>}, {pipeline_mode = #tpu.pipeline_mode<synchronous>, transform_indices = @transform_13, window_bounds = array<i64: 64, 32>}, {pipeline_mode = #tpu.pipeline_mode<synchronous>, transform_indices = @transform_14, window_bounds = array<i64: 8, 32>}]} {
    %c0 = arith.constant 0 : index
    %c0_0 = arith.constant 0 : index
    %0 = vector.load %arg1[%c0, %c0_0] : memref<8x32xf32, #tpu.memory_space<vmem>>, vector<8x32xf32>
    %1 = arith.truncf %0 : vector<8x32xf32> to vector<8x32xbf16>
    %c0_1 = arith.constant 0 : index
    %c0_2 = arith.constant 0 : index
    %2 = vector.load %arg13[%c0_1, %c0_2] : memref<32x128xbf16, #tpu.memory_space<vmem>>, vector<32x128xbf16>
    %cst = arith.constant dense<0.000000e+00> : vector<8x128xf32>
    %3 = tpu.matmul %1, %2, %cst {dimension_numbers = #tpu.dot_dimension_numbers<[1], [0], [0], [1], [0, 0, 1, 1], [], []>} : vector<8x32xbf16>, vector<32x128xbf16>, vector<8x128xf32> -> vector<8x128xf32>
    %4 = vector.extract_strided_slice %3 {offsets = [0, 0], sizes = [8, 64], strides = [1, 1]} : vector<8x128xf32> to vector<8x64xf32>
    %5 = vector.extract_strided_slice %3 {offsets = [0, 64], sizes = [8, 64], strides = [1, 1]} : vector<8x128xf32> to vector<8x64xf32>
    %6 = arith.negf %4 : vector<8x64xf32>
    %7 = math.exp %6 : vector<8x64xf32>
    %cst_3 = arith.constant 1.000000e+00 : f32
    %8 = vector.broadcast %cst_3 : f32 to vector<8x64xf32>
    %9 = arith.addf %8, %7 : vector<8x64xf32>
    %10 = arith.divf %8, %9 : vector<8x64xf32>
    %11 = arith.mulf %4, %10 : vector<8x64xf32>
    %12 = arith.mulf %11, %5 : vector<8x64xf32>
    %13 = arith.truncf %12 : vector<8x64xf32> to vector<8x64xbf16>
    %c0_4 = arith.constant 0 : index
    %c0_5 = arith.constant 0 : index
    %14 = vector.load %arg14[%c0_4, %c0_5] : memref<64x32xbf16, #tpu.memory_space<vmem>>, vector<64x32xbf16>
    %cst_6 = arith.constant dense<0.000000e+00> : vector<8x32xf32>
    %15 = tpu.matmul %13, %14, %cst_6 {dimension_numbers = #tpu.dot_dimension_numbers<[1], [0], [0], [1], [0, 0, 1, 1], [], []>} : vector<8x64xbf16>, vector<64x32xbf16>, vector<8x32xf32> -> vector<8x32xf32>
    %c0_7 = arith.constant 0 : index
    %c0_8 = arith.constant 0 : index
    %c0_9 = arith.constant 0 : index
    %16 = vector.load %arg2[%c0_7, %c0_8, %c0_9] : memref<2x8x4xf32, #tpu.memory_space<vmem>>, vector<1x8x4xf32>
    %17 = vector.shape_cast %16 : vector<1x8x4xf32> to vector<8x4xf32>
    %c0_10 = arith.constant 0 : index
    %c0_11 = arith.constant 0 : index
    %c0_12 = arith.constant 0 : index
    %18 = vector.load %arg5[%c0_10, %c0_11, %c0_12] : memref<2x8x1xf32, #tpu.memory_space<vmem>>, vector<1x8x1xf32>
    %19 = vector.shape_cast %18 : vector<1x8x1xf32> to vector<8x1xf32>
    %c0_13 = arith.constant 0 : index
    %c0_14 = arith.constant 0 : index
    %c0_15 = arith.constant 0 : index
    %20 = vector.load %arg6[%c0_13, %c0_14, %c0_15] : memref<2x4x32xf32, #tpu.memory_space<vmem>>, vector<1x4x32xf32>
    %21 = vector.shape_cast %20 : vector<1x4x32xf32> to vector<4x32xf32>
    %cst_16 = arith.constant 0.000000e+00 : f32
    %22 = vector.broadcast %cst_16 : f32 to vector<8x1xf32>
    %23 = arith.cmpf one, %19, %22 : vector<8x1xf32>
    %24 = arith.extui %23 : vector<8x1xi1> to vector<8x1xi32>
    %25 = arith.sitofp %24 : vector<8x1xi32> to vector<8x1xf32>
    %26 = vector.shape_cast %25 : vector<8x1xf32> to vector<1x8x1xf32>
    %cst_17 = arith.constant dense<0.000000e+00> : vector<1xf32>
    %27 = vector.multi_reduction <add>, %26, %cst_17 [1, 2] : vector<1x8x1xf32> to vector<1xf32>
    %28 = vector.shape_cast %27 : vector<1xf32> to vector<1x1x1xf32>
    %29 = vector.extract %28[0, 0, 0] : f32 from vector<1x1x1xf32>
    %cst_18 = arith.constant 1.000000e+00 : f32
    %30 = arith.maximumf %29, %cst_18 : f32
    %31 = vector.extract_strided_slice %17 {offsets = [0, 0], sizes = [8, 1], strides = [1, 1]} : vector<8x4xf32> to vector<8x1xf32>
    %32 = vector.extract_strided_slice %21 {offsets = [0, 0], sizes = [1, 32], strides = [1, 1]} : vector<4x32xf32> to vector<1x32xf32>
    %33 = vector.broadcast %31 : vector<8x1xf32> to vector<8x32xf32>
    %34 = vector.broadcast %32 : vector<1x32xf32> to vector<8x32xf32>
    %35 = arith.mulf %33, %34 : vector<8x32xf32>
    %36 = arith.addf %0, %35 : vector<8x32xf32>
    %37 = vector.extract_strided_slice %17 {offsets = [0, 1], sizes = [8, 1], strides = [1, 1]} : vector<8x4xf32> to vector<8x1xf32>
    %38 = vector.extract_strided_slice %21 {offsets = [1, 0], sizes = [1, 32], strides = [1, 1]} : vector<4x32xf32> to vector<1x32xf32>
    %39 = vector.broadcast %37 : vector<8x1xf32> to vector<8x32xf32>
    %40 = vector.broadcast %38 : vector<1x32xf32> to vector<8x32xf32>
    %41 = arith.mulf %39, %40 : vector<8x32xf32>
    %42 = arith.addf %36, %41 : vector<8x32xf32>
    %43 = vector.extract_strided_slice %17 {offsets = [0, 2], sizes = [8, 1], strides = [1, 1]} : vector<8x4xf32> to vector<8x1xf32>
    %44 = vector.extract_strided_slice %21 {offsets = [2, 0], sizes = [1, 32], strides = [1, 1]} : vector<4x32xf32> to vector<1x32xf32>
    %45 = vector.broadcast %43 : vector<8x1xf32> to vector<8x32xf32>
    %46 = vector.broadcast %44 : vector<1x32xf32> to vector<8x32xf32>
    %47 = arith.mulf %45, %46 : vector<8x32xf32>
    %48 = arith.addf %42, %47 : vector<8x32xf32>
    %49 = vector.extract_strided_slice %17 {offsets = [0, 3], sizes = [8, 1], strides = [1, 1]} : vector<8x4xf32> to vector<8x1xf32>
    %50 = vector.extract_strided_slice %21 {offsets = [3, 0], sizes = [1, 32], strides = [1, 1]} : vector<4x32xf32> to vector<1x32xf32>
    %51 = vector.broadcast %49 : vector<8x1xf32> to vector<8x32xf32>
    %52 = vector.broadcast %50 : vector<1x32xf32> to vector<8x32xf32>
    %53 = arith.mulf %51, %52 : vector<8x32xf32>
    %54 = arith.addf %48, %53 : vector<8x32xf32>
    %55 = arith.truncf %54 : vector<8x32xf32> to vector<8x32xbf16>
    %c0_19 = arith.constant 0 : index
    %c0_20 = arith.constant 0 : index
    %c0_21 = arith.constant 0 : index
    %56 = vector.load %arg7[%c0_19, %c0_20, %c0_21] : memref<2x32x128xbf16, #tpu.memory_space<vmem>>, vector<1x32x128xbf16>
    %57 = vector.shape_cast %56 : vector<1x32x128xbf16> to vector<32x128xbf16>
    %cst_22 = arith.constant dense<0.000000e+00> : vector<8x128xf32>
    %58 = tpu.matmul %55, %57, %cst_22 {dimension_numbers = #tpu.dot_dimension_numbers<[1], [0], [0], [1], [0, 0, 1, 1], [], []>} : vector<8x32xbf16>, vector<32x128xbf16>, vector<8x128xf32> -> vector<8x128xf32>
    %c0_23 = arith.constant 0 : index
    %c0_24 = arith.constant 0 : index
    %c0_25 = arith.constant 0 : index
    %59 = vector.load %arg8[%c0_23, %c0_24, %c0_25] : memref<2x32x64xbf16, #tpu.memory_space<vmem>>, vector<1x32x64xbf16>
    %60 = vector.shape_cast %59 : vector<1x32x64xbf16> to vector<32x64xbf16>
    %cst_26 = arith.constant dense<0.000000e+00> : vector<8x64xf32>
    %61 = tpu.matmul %55, %60, %cst_26 {dimension_numbers = #tpu.dot_dimension_numbers<[1], [0], [0], [1], [0, 0, 1, 1], [], []>} : vector<8x32xbf16>, vector<32x64xbf16>, vector<8x64xf32> -> vector<8x64xf32>
    %c0_27 = arith.constant 0 : index
    %c0_28 = arith.constant 0 : index
    %c0_29 = arith.constant 0 : index
    %62 = vector.load %arg3[%c0_27, %c0_28, %c0_29] : memref<2x8x64xf32, #tpu.memory_space<vmem>>, vector<1x8x64xf32>
    %63 = vector.shape_cast %62 : vector<1x8x64xf32> to vector<8x64xf32>
    %64 = arith.mulf %61, %63 : vector<8x64xf32>
    %65 = arith.truncf %64 : vector<8x64xf32> to vector<8x64xbf16>
    %c0_30 = arith.constant 0 : index
    %c0_31 = arith.constant 0 : index
    %c0_32 = arith.constant 0 : index
    %66 = vector.load %arg9[%c0_30, %c0_31, %c0_32] : memref<2x64x128xbf16, #tpu.memory_space<vmem>>, vector<1x64x128xbf16>
    %67 = vector.shape_cast %66 : vector<1x64x128xbf16> to vector<64x128xbf16>
    %cst_33 = arith.constant dense<0.000000e+00> : vector<8x128xf32>
    %68 = tpu.matmul %65, %67, %cst_33 {dimension_numbers = #tpu.dot_dimension_numbers<[1], [0], [0], [1], [0, 0, 1, 1], [], []>} : vector<8x64xbf16>, vector<64x128xbf16>, vector<8x128xf32> -> vector<8x128xf32>
    %69 = math.absf %58 : vector<8x128xf32>
    %70 = vector.broadcast %25 : vector<8x1xf32> to vector<8x128xf32>
    %71 = arith.mulf %69, %70 : vector<8x128xf32>
    %cst_34 = arith.constant dense<0.000000e+00> : vector<128xf32>
    %72 = vector.multi_reduction <add>, %71, %cst_34 [0] : vector<8x128xf32> to vector<128xf32>
    %73 = vector.shape_cast %72 : vector<128xf32> to vector<1x128xf32>
    %74 = vector.broadcast %30 : f32 to vector<1x128xf32>
    %75 = arith.divf %73, %74 : vector<1x128xf32>
    %76 = math.absf %68 : vector<8x128xf32>
    %77 = vector.broadcast %25 : vector<8x1xf32> to vector<8x128xf32>
    %78 = arith.mulf %76, %77 : vector<8x128xf32>
    %cst_35 = arith.constant dense<0.000000e+00> : vector<128xf32>
    %79 = vector.multi_reduction <add>, %78, %cst_35 [0] : vector<8x128xf32> to vector<128xf32>
    %80 = vector.shape_cast %79 : vector<128xf32> to vector<1x128xf32>
    %81 = vector.broadcast %30 : f32 to vector<1x128xf32>
    %82 = arith.divf %80, %81 : vector<1x128xf32>
    %cst_36 = arith.constant 9.99999993E-9 : f32
    %83 = vector.broadcast %cst_36 : f32 to vector<1x128xf32>
    %84 = arith.addf %82, %83 : vector<1x128xf32>
    %85 = arith.divf %75, %84 : vector<1x128xf32>
    %86 = vector.broadcast %85 : vector<1x128xf32> to vector<8x128xf32>
    %87 = arith.mulf %86, %68 : vector<8x128xf32>
    %88 = arith.addf %58, %87 : vector<8x128xf32>
    %89 = vector.extract_strided_slice %88 {offsets = [0, 0], sizes = [8, 64], strides = [1, 1]} : vector<8x128xf32> to vector<8x64xf32>
    %90 = vector.extract_strided_slice %88 {offsets = [0, 64], sizes = [8, 64], strides = [1, 1]} : vector<8x128xf32> to vector<8x64xf32>
    %91 = arith.negf %89 : vector<8x64xf32>
    %92 = math.exp %91 : vector<8x64xf32>
    %cst_37 = arith.constant 1.000000e+00 : f32
    %93 = vector.broadcast %cst_37 : f32 to vector<8x64xf32>
    %94 = arith.addf %93, %92 : vector<8x64xf32>
    %95 = arith.divf %93, %94 : vector<8x64xf32>
    %96 = arith.mulf %89, %95 : vector<8x64xf32>
    %97 = arith.mulf %96, %90 : vector<8x64xf32>
    %98 = arith.truncf %97 : vector<8x64xf32> to vector<8x64xbf16>
    %c0_38 = arith.constant 0 : index
    %c0_39 = arith.constant 0 : index
    %c0_40 = arith.constant 0 : index
    %99 = vector.load %arg10[%c0_38, %c0_39, %c0_40] : memref<2x64x32xbf16, #tpu.memory_space<vmem>>, vector<1x64x32xbf16>
    %100 = vector.shape_cast %99 : vector<1x64x32xbf16> to vector<64x32xbf16>
    %cst_41 = arith.constant dense<0.000000e+00> : vector<8x32xf32>
    %101 = tpu.matmul %98, %100, %cst_41 {dimension_numbers = #tpu.dot_dimension_numbers<[1], [0], [0], [1], [0, 0, 1, 1], [], []>} : vector<8x64xbf16>, vector<64x32xbf16>, vector<8x32xf32> -> vector<8x32xf32>
    %c0_42 = arith.constant 0 : index
    %c0_43 = arith.constant 0 : index
    %c0_44 = arith.constant 0 : index
    %102 = vector.load %arg11[%c0_42, %c0_43, %c0_44] : memref<2x64x32xbf16, #tpu.memory_space<vmem>>, vector<1x64x32xbf16>
    %103 = vector.shape_cast %102 : vector<1x64x32xbf16> to vector<64x32xbf16>
    %cst_45 = arith.constant dense<0.000000e+00> : vector<8x32xf32>
    %104 = tpu.matmul %98, %103, %cst_45 {dimension_numbers = #tpu.dot_dimension_numbers<[1], [0], [0], [1], [0, 0, 1, 1], [], []>} : vector<8x64xbf16>, vector<64x32xbf16>, vector<8x32xf32> -> vector<8x32xf32>
    %c0_46 = arith.constant 0 : index
    %c0_47 = arith.constant 0 : index
    %c0_48 = arith.constant 0 : index
    %105 = vector.load %arg4[%c0_46, %c0_47, %c0_48] : memref<2x8x32xf32, #tpu.memory_space<vmem>>, vector<1x8x32xf32>
    %106 = vector.shape_cast %105 : vector<1x8x32xf32> to vector<8x32xf32>
    %107 = arith.mulf %104, %106 : vector<8x32xf32>
    %108 = arith.truncf %107 : vector<8x32xf32> to vector<8x32xbf16>
    %c0_49 = arith.constant 0 : index
    %c0_50 = arith.constant 0 : index
    %c0_51 = arith.constant 0 : index
    %109 = vector.load %arg12[%c0_49, %c0_50, %c0_51] : memref<2x32x32xbf16, #tpu.memory_space<vmem>>, vector<1x32x32xbf16>
    %110 = vector.shape_cast %109 : vector<1x32x32xbf16> to vector<32x32xbf16>
    %cst_52 = arith.constant dense<0.000000e+00> : vector<8x32xf32>
    %111 = tpu.matmul %108, %110, %cst_52 {dimension_numbers = #tpu.dot_dimension_numbers<[1], [0], [0], [1], [0, 0, 1, 1], [], []>} : vector<8x32xbf16>, vector<32x32xbf16>, vector<8x32xf32> -> vector<8x32xf32>
    %112 = math.absf %101 : vector<8x32xf32>
    %113 = vector.broadcast %25 : vector<8x1xf32> to vector<8x32xf32>
    %114 = arith.mulf %112, %113 : vector<8x32xf32>
    %cst_53 = arith.constant dense<0.000000e+00> : vector<32xf32>
    %115 = vector.multi_reduction <add>, %114, %cst_53 [0] : vector<8x32xf32> to vector<32xf32>
    %116 = vector.shape_cast %115 : vector<32xf32> to vector<1x32xf32>
    %117 = vector.broadcast %30 : f32 to vector<1x32xf32>
    %118 = arith.divf %116, %117 : vector<1x32xf32>
    %119 = math.absf %111 : vector<8x32xf32>
    %120 = vector.broadcast %25 : vector<8x1xf32> to vector<8x32xf32>
    %121 = arith.mulf %119, %120 : vector<8x32xf32>
    %cst_54 = arith.constant dense<0.000000e+00> : vector<32xf32>
    %122 = vector.multi_reduction <add>, %121, %cst_54 [0] : vector<8x32xf32> to vector<32xf32>
    %123 = vector.shape_cast %122 : vector<32xf32> to vector<1x32xf32>
    %124 = vector.broadcast %30 : f32 to vector<1x32xf32>
    %125 = arith.divf %123, %124 : vector<1x32xf32>
    %cst_55 = arith.constant 9.99999993E-9 : f32
    %126 = vector.broadcast %cst_55 : f32 to vector<1x32xf32>
    %127 = arith.addf %125, %126 : vector<1x32xf32>
    %128 = arith.divf %118, %127 : vector<1x32xf32>
    %129 = vector.broadcast %128 : vector<1x32xf32> to vector<8x32xf32>
    %130 = arith.mulf %129, %111 : vector<8x32xf32>
    %131 = arith.addf %101, %130 : vector<8x32xf32>
    %132 = vector.broadcast %19 : vector<8x1xf32> to vector<8x32xf32>
    %133 = arith.mulf %132, %131 : vector<8x32xf32>
    %134 = arith.addf %15, %133 : vector<8x32xf32>
    %c1 = arith.constant 1 : index
    %c0_56 = arith.constant 0 : index
    %c0_57 = arith.constant 0 : index
    %135 = vector.load %arg2[%c1, %c0_56, %c0_57] : memref<2x8x4xf32, #tpu.memory_space<vmem>>, vector<1x8x4xf32>
    %136 = vector.shape_cast %135 : vector<1x8x4xf32> to vector<8x4xf32>
    %c1_58 = arith.constant 1 : index
    %c0_59 = arith.constant 0 : index
    %c0_60 = arith.constant 0 : index
    %137 = vector.load %arg5[%c1_58, %c0_59, %c0_60] : memref<2x8x1xf32, #tpu.memory_space<vmem>>, vector<1x8x1xf32>
    %138 = vector.shape_cast %137 : vector<1x8x1xf32> to vector<8x1xf32>
    %c1_61 = arith.constant 1 : index
    %c0_62 = arith.constant 0 : index
    %c0_63 = arith.constant 0 : index
    %139 = vector.load %arg6[%c1_61, %c0_62, %c0_63] : memref<2x4x32xf32, #tpu.memory_space<vmem>>, vector<1x4x32xf32>
    %140 = vector.shape_cast %139 : vector<1x4x32xf32> to vector<4x32xf32>
    %cst_64 = arith.constant 0.000000e+00 : f32
    %141 = vector.broadcast %cst_64 : f32 to vector<8x1xf32>
    %142 = arith.cmpf one, %138, %141 : vector<8x1xf32>
    %143 = arith.extui %142 : vector<8x1xi1> to vector<8x1xi32>
    %144 = arith.sitofp %143 : vector<8x1xi32> to vector<8x1xf32>
    %145 = vector.shape_cast %144 : vector<8x1xf32> to vector<1x8x1xf32>
    %cst_65 = arith.constant dense<0.000000e+00> : vector<1xf32>
    %146 = vector.multi_reduction <add>, %145, %cst_65 [1, 2] : vector<1x8x1xf32> to vector<1xf32>
    %147 = vector.shape_cast %146 : vector<1xf32> to vector<1x1x1xf32>
    %148 = vector.extract %147[0, 0, 0] : f32 from vector<1x1x1xf32>
    %cst_66 = arith.constant 1.000000e+00 : f32
    %149 = arith.maximumf %148, %cst_66 : f32
    %150 = vector.extract_strided_slice %136 {offsets = [0, 0], sizes = [8, 1], strides = [1, 1]} : vector<8x4xf32> to vector<8x1xf32>
    %151 = vector.extract_strided_slice %140 {offsets = [0, 0], sizes = [1, 32], strides = [1, 1]} : vector<4x32xf32> to vector<1x32xf32>
    %152 = vector.broadcast %150 : vector<8x1xf32> to vector<8x32xf32>
    %153 = vector.broadcast %151 : vector<1x32xf32> to vector<8x32xf32>
    %154 = arith.mulf %152, %153 : vector<8x32xf32>
    %155 = arith.addf %0, %154 : vector<8x32xf32>
    %156 = vector.extract_strided_slice %136 {offsets = [0, 1], sizes = [8, 1], strides = [1, 1]} : vector<8x4xf32> to vector<8x1xf32>
    %157 = vector.extract_strided_slice %140 {offsets = [1, 0], sizes = [1, 32], strides = [1, 1]} : vector<4x32xf32> to vector<1x32xf32>
    %158 = vector.broadcast %156 : vector<8x1xf32> to vector<8x32xf32>
    %159 = vector.broadcast %157 : vector<1x32xf32> to vector<8x32xf32>
    %160 = arith.mulf %158, %159 : vector<8x32xf32>
    %161 = arith.addf %155, %160 : vector<8x32xf32>
    %162 = vector.extract_strided_slice %136 {offsets = [0, 2], sizes = [8, 1], strides = [1, 1]} : vector<8x4xf32> to vector<8x1xf32>
    %163 = vector.extract_strided_slice %140 {offsets = [2, 0], sizes = [1, 32], strides = [1, 1]} : vector<4x32xf32> to vector<1x32xf32>
    %164 = vector.broadcast %162 : vector<8x1xf32> to vector<8x32xf32>
    %165 = vector.broadcast %163 : vector<1x32xf32> to vector<8x32xf32>
    %166 = arith.mulf %164, %165 : vector<8x32xf32>
    %167 = arith.addf %161, %166 : vector<8x32xf32>
    %168 = vector.extract_strided_slice %136 {offsets = [0, 3], sizes = [8, 1], strides = [1, 1]} : vector<8x4xf32> to vector<8x1xf32>
    %169 = vector.extract_strided_slice %140 {offsets = [3, 0], sizes = [1, 32], strides = [1, 1]} : vector<4x32xf32> to vector<1x32xf32>
    %170 = vector.broadcast %168 : vector<8x1xf32> to vector<8x32xf32>
    %171 = vector.broadcast %169 : vector<1x32xf32> to vector<8x32xf32>
    %172 = arith.mulf %170, %171 : vector<8x32xf32>
    %173 = arith.addf %167, %172 : vector<8x32xf32>
    %174 = arith.truncf %173 : vector<8x32xf32> to vector<8x32xbf16>
    %c1_67 = arith.constant 1 : index
    %c0_68 = arith.constant 0 : index
    %c0_69 = arith.constant 0 : index
    %175 = vector.load %arg7[%c1_67, %c0_68, %c0_69] : memref<2x32x128xbf16, #tpu.memory_space<vmem>>, vector<1x32x128xbf16>
    %176 = vector.shape_cast %175 : vector<1x32x128xbf16> to vector<32x128xbf16>
    %cst_70 = arith.constant dense<0.000000e+00> : vector<8x128xf32>
    %177 = tpu.matmul %174, %176, %cst_70 {dimension_numbers = #tpu.dot_dimension_numbers<[1], [0], [0], [1], [0, 0, 1, 1], [], []>} : vector<8x32xbf16>, vector<32x128xbf16>, vector<8x128xf32> -> vector<8x128xf32>
    %c1_71 = arith.constant 1 : index
    %c0_72 = arith.constant 0 : index
    %c0_73 = arith.constant 0 : index
    %178 = vector.load %arg8[%c1_71, %c0_72, %c0_73] : memref<2x32x64xbf16, #tpu.memory_space<vmem>>, vector<1x32x64xbf16>
    %179 = vector.shape_cast %178 : vector<1x32x64xbf16> to vector<32x64xbf16>
    %cst_74 = arith.constant dense<0.000000e+00> : vector<8x64xf32>
    %180 = tpu.matmul %174, %179, %cst_74 {dimension_numbers = #tpu.dot_dimension_numbers<[1], [0], [0], [1], [0, 0, 1, 1], [], []>} : vector<8x32xbf16>, vector<32x64xbf16>, vector<8x64xf32> -> vector<8x64xf32>
    %c1_75 = arith.constant 1 : index
    %c0_76 = arith.constant 0 : index
    %c0_77 = arith.constant 0 : index
    %181 = vector.load %arg3[%c1_75, %c0_76, %c0_77] : memref<2x8x64xf32, #tpu.memory_space<vmem>>, vector<1x8x64xf32>
    %182 = vector.shape_cast %181 : vector<1x8x64xf32> to vector<8x64xf32>
    %183 = arith.mulf %180, %182 : vector<8x64xf32>
    %184 = arith.truncf %183 : vector<8x64xf32> to vector<8x64xbf16>
    %c1_78 = arith.constant 1 : index
    %c0_79 = arith.constant 0 : index
    %c0_80 = arith.constant 0 : index
    %185 = vector.load %arg9[%c1_78, %c0_79, %c0_80] : memref<2x64x128xbf16, #tpu.memory_space<vmem>>, vector<1x64x128xbf16>
    %186 = vector.shape_cast %185 : vector<1x64x128xbf16> to vector<64x128xbf16>
    %cst_81 = arith.constant dense<0.000000e+00> : vector<8x128xf32>
    %187 = tpu.matmul %184, %186, %cst_81 {dimension_numbers = #tpu.dot_dimension_numbers<[1], [0], [0], [1], [0, 0, 1, 1], [], []>} : vector<8x64xbf16>, vector<64x128xbf16>, vector<8x128xf32> -> vector<8x128xf32>
    %188 = math.absf %177 : vector<8x128xf32>
    %189 = vector.broadcast %144 : vector<8x1xf32> to vector<8x128xf32>
    %190 = arith.mulf %188, %189 : vector<8x128xf32>
    %cst_82 = arith.constant dense<0.000000e+00> : vector<128xf32>
    %191 = vector.multi_reduction <add>, %190, %cst_82 [0] : vector<8x128xf32> to vector<128xf32>
    %192 = vector.shape_cast %191 : vector<128xf32> to vector<1x128xf32>
    %193 = vector.broadcast %149 : f32 to vector<1x128xf32>
    %194 = arith.divf %192, %193 : vector<1x128xf32>
    %195 = math.absf %187 : vector<8x128xf32>
    %196 = vector.broadcast %144 : vector<8x1xf32> to vector<8x128xf32>
    %197 = arith.mulf %195, %196 : vector<8x128xf32>
    %cst_83 = arith.constant dense<0.000000e+00> : vector<128xf32>
    %198 = vector.multi_reduction <add>, %197, %cst_83 [0] : vector<8x128xf32> to vector<128xf32>
    %199 = vector.shape_cast %198 : vector<128xf32> to vector<1x128xf32>
    %200 = vector.broadcast %149 : f32 to vector<1x128xf32>
    %201 = arith.divf %199, %200 : vector<1x128xf32>
    %cst_84 = arith.constant 9.99999993E-9 : f32
    %202 = vector.broadcast %cst_84 : f32 to vector<1x128xf32>
    %203 = arith.addf %201, %202 : vector<1x128xf32>
    %204 = arith.divf %194, %203 : vector<1x128xf32>
    %205 = vector.broadcast %204 : vector<1x128xf32> to vector<8x128xf32>
    %206 = arith.mulf %205, %187 : vector<8x128xf32>
    %207 = arith.addf %177, %206 : vector<8x128xf32>
    %208 = vector.extract_strided_slice %207 {offsets = [0, 0], sizes = [8, 64], strides = [1, 1]} : vector<8x128xf32> to vector<8x64xf32>
    %209 = vector.extract_strided_slice %207 {offsets = [0, 64], sizes = [8, 64], strides = [1, 1]} : vector<8x128xf32> to vector<8x64xf32>
    %210 = arith.negf %208 : vector<8x64xf32>
    %211 = math.exp %210 : vector<8x64xf32>
    %cst_85 = arith.constant 1.000000e+00 : f32
    %212 = vector.broadcast %cst_85 : f32 to vector<8x64xf32>
    %213 = arith.addf %212, %211 : vector<8x64xf32>
    %214 = arith.divf %212, %213 : vector<8x64xf32>
    %215 = arith.mulf %208, %214 : vector<8x64xf32>
    %216 = arith.mulf %215, %209 : vector<8x64xf32>
    %217 = arith.truncf %216 : vector<8x64xf32> to vector<8x64xbf16>
    %c1_86 = arith.constant 1 : index
    %c0_87 = arith.constant 0 : index
    %c0_88 = arith.constant 0 : index
    %218 = vector.load %arg10[%c1_86, %c0_87, %c0_88] : memref<2x64x32xbf16, #tpu.memory_space<vmem>>, vector<1x64x32xbf16>
    %219 = vector.shape_cast %218 : vector<1x64x32xbf16> to vector<64x32xbf16>
    %cst_89 = arith.constant dense<0.000000e+00> : vector<8x32xf32>
    %220 = tpu.matmul %217, %219, %cst_89 {dimension_numbers = #tpu.dot_dimension_numbers<[1], [0], [0], [1], [0, 0, 1, 1], [], []>} : vector<8x64xbf16>, vector<64x32xbf16>, vector<8x32xf32> -> vector<8x32xf32>
    %c1_90 = arith.constant 1 : index
    %c0_91 = arith.constant 0 : index
    %c0_92 = arith.constant 0 : index
    %221 = vector.load %arg11[%c1_90, %c0_91, %c0_92] : memref<2x64x32xbf16, #tpu.memory_space<vmem>>, vector<1x64x32xbf16>
    %222 = vector.shape_cast %221 : vector<1x64x32xbf16> to vector<64x32xbf16>
    %cst_93 = arith.constant dense<0.000000e+00> : vector<8x32xf32>
    %223 = tpu.matmul %217, %222, %cst_93 {dimension_numbers = #tpu.dot_dimension_numbers<[1], [0], [0], [1], [0, 0, 1, 1], [], []>} : vector<8x64xbf16>, vector<64x32xbf16>, vector<8x32xf32> -> vector<8x32xf32>
    %c1_94 = arith.constant 1 : index
    %c0_95 = arith.constant 0 : index
    %c0_96 = arith.constant 0 : index
    %224 = vector.load %arg4[%c1_94, %c0_95, %c0_96] : memref<2x8x32xf32, #tpu.memory_space<vmem>>, vector<1x8x32xf32>
    %225 = vector.shape_cast %224 : vector<1x8x32xf32> to vector<8x32xf32>
    %226 = arith.mulf %223, %225 : vector<8x32xf32>
    %227 = arith.truncf %226 : vector<8x32xf32> to vector<8x32xbf16>
    %c1_97 = arith.constant 1 : index
    %c0_98 = arith.constant 0 : index
    %c0_99 = arith.constant 0 : index
    %228 = vector.load %arg12[%c1_97, %c0_98, %c0_99] : memref<2x32x32xbf16, #tpu.memory_space<vmem>>, vector<1x32x32xbf16>
    %229 = vector.shape_cast %228 : vector<1x32x32xbf16> to vector<32x32xbf16>
    %cst_100 = arith.constant dense<0.000000e+00> : vector<8x32xf32>
    %230 = tpu.matmul %227, %229, %cst_100 {dimension_numbers = #tpu.dot_dimension_numbers<[1], [0], [0], [1], [0, 0, 1, 1], [], []>} : vector<8x32xbf16>, vector<32x32xbf16>, vector<8x32xf32> -> vector<8x32xf32>
    %231 = math.absf %220 : vector<8x32xf32>
    %232 = vector.broadcast %144 : vector<8x1xf32> to vector<8x32xf32>
    %233 = arith.mulf %231, %232 : vector<8x32xf32>
    %cst_101 = arith.constant dense<0.000000e+00> : vector<32xf32>
    %234 = vector.multi_reduction <add>, %233, %cst_101 [0] : vector<8x32xf32> to vector<32xf32>
    %235 = vector.shape_cast %234 : vector<32xf32> to vector<1x32xf32>
    %236 = vector.broadcast %149 : f32 to vector<1x32xf32>
    %237 = arith.divf %235, %236 : vector<1x32xf32>
    %238 = math.absf %230 : vector<8x32xf32>
    %239 = vector.broadcast %144 : vector<8x1xf32> to vector<8x32xf32>
    %240 = arith.mulf %238, %239 : vector<8x32xf32>
    %cst_102 = arith.constant dense<0.000000e+00> : vector<32xf32>
    %241 = vector.multi_reduction <add>, %240, %cst_102 [0] : vector<8x32xf32> to vector<32xf32>
    %242 = vector.shape_cast %241 : vector<32xf32> to vector<1x32xf32>
    %243 = vector.broadcast %149 : f32 to vector<1x32xf32>
    %244 = arith.divf %242, %243 : vector<1x32xf32>
    %cst_103 = arith.constant 9.99999993E-9 : f32
    %245 = vector.broadcast %cst_103 : f32 to vector<1x32xf32>
    %246 = arith.addf %244, %245 : vector<1x32xf32>
    %247 = arith.divf %237, %246 : vector<1x32xf32>
    %248 = vector.broadcast %247 : vector<1x32xf32> to vector<8x32xf32>
    %249 = arith.mulf %248, %230 : vector<8x32xf32>
    %250 = arith.addf %220, %249 : vector<8x32xf32>
    %251 = vector.broadcast %138 : vector<8x1xf32> to vector<8x32xf32>
    %252 = arith.mulf %251, %250 : vector<8x32xf32>
    %253 = arith.addf %134, %252 : vector<8x32xf32>
    %c0_104 = arith.constant 0 : index
    %c0_105 = arith.constant 0 : index
    %254 = vector.load %arg15[%c0_104, %c0_105] : memref<8x32xf32, #tpu.memory_space<vmem>>, vector<8x32xf32>
    tpu.vector_store %arg15[%c0_104, %c0_105], %253 {strides = array<i32>} : memref<8x32xf32, #tpu.memory_space<vmem>>, vector<8x32xf32>,
    return
  }
  func.func @transform_0(%arg0: i32) -> (i32, i32) {
    %c0_i32 = arith.constant 0 : i32
    %c0_i32_0 = arith.constant 0 : i32
    %c0_i32_1 = arith.constant 0 : i32
    return %c0_i32, %c0_i32_0 : i32, i32
  }
  func.func @transform_1(%arg0: i32) -> (i32, i32, i32) {
    %c0_i32 = arith.constant 0 : i32
    %c0_i32_0 = arith.constant 0 : i32
    %c0_i32_1 = arith.constant 0 : i32
    %c0_i32_2 = arith.constant 0 : i32
    return %c0_i32, %c0_i32_0, %c0_i32_1 : i32, i32, i32
  }
  func.func @transform_2(%arg0: i32) -> (i32, i32, i32) {
    %c0_i32 = arith.constant 0 : i32
    %c0_i32_0 = arith.constant 0 : i32
    %c0_i32_1 = arith.constant 0 : i32
    %c0_i32_2 = arith.constant 0 : i32
    return %c0_i32, %c0_i32_0, %c0_i32_1 : i32, i32, i32
  }
  func.func @transform_3(%arg0: i32) -> (i32, i32, i32) {
    %c0_i32 = arith.constant 0 : i32
    %c0_i32_0 = arith.constant 0 : i32
    %c0_i32_1 = arith.constant 0 : i32
    %c0_i32_2 = arith.constant 0 : i32
    return %c0_i32, %c0_i32_0, %c0_i32_1 : i32, i32, i32
  }
  func.func @transform_4(%arg0: i32) -> (i32, i32, i32) {
    %c0_i32 = arith.constant 0 : i32
    %c0_i32_0 = arith.constant 0 : i32
    %c0_i32_1 = arith.constant 0 : i32
    %c0_i32_2 = arith.constant 0 : i32
    return %c0_i32, %c0_i32_0, %c0_i32_1 : i32, i32, i32
  }
  func.func @transform_5(%arg0: i32) -> (i32, i32, i32) {
    %c0_i32 = arith.constant 0 : i32
    %c0_i32_0 = arith.constant 0 : i32
    %c0_i32_1 = arith.constant 0 : i32
    %c0_i32_2 = arith.constant 0 : i32
    return %c0_i32, %c0_i32_0, %c0_i32_1 : i32, i32, i32
  }
  func.func @transform_6(%arg0: i32) -> (i32, i32, i32) {
    %c0_i32 = arith.constant 0 : i32
    %c0_i32_0 = arith.constant 0 : i32
    %c0_i32_1 = arith.constant 0 : i32
    %c0_i32_2 = arith.constant 0 : i32
    return %c0_i32, %c0_i32_0, %c0_i32_1 : i32, i32, i32
  }
  func.func @transform_7(%arg0: i32) -> (i32, i32, i32) {
    %c0_i32 = arith.constant 0 : i32
    %c0_i32_0 = arith.constant 0 : i32
    %c0_i32_1 = arith.constant 0 : i32
    %c0_i32_2 = arith.constant 0 : i32
    return %c0_i32, %c0_i32_0, %c0_i32_1 : i32, i32, i32
  }
  func.func @transform_8(%arg0: i32) -> (i32, i32, i32) {
    %c0_i32 = arith.constant 0 : i32
    %c0_i32_0 = arith.constant 0 : i32
    %c0_i32_1 = arith.constant 0 : i32
    %c0_i32_2 = arith.constant 0 : i32
    return %c0_i32, %c0_i32_0, %c0_i32_1 : i32, i32, i32
  }
  func.func @transform_9(%arg0: i32) -> (i32, i32, i32) {
    %c0_i32 = arith.constant 0 : i32
    %c0_i32_0 = arith.constant 0 : i32
    %c0_i32_1 = arith.constant 0 : i32
    %c0_i32_2 = arith.constant 0 : i32
    return %c0_i32, %c0_i32_0, %c0_i32_1 : i32, i32, i32
  }
  func.func @transform_10(%arg0: i32) -> (i32, i32, i32) {
    %c0_i32 = arith.constant 0 : i32
    %c0_i32_0 = arith.constant 0 : i32
    %c0_i32_1 = arith.constant 0 : i32
    %c0_i32_2 = arith.constant 0 : i32
    return %c0_i32, %c0_i32_0, %c0_i32_1 : i32, i32, i32
  }
  func.func @transform_11(%arg0: i32) -> (i32, i32, i32) {
    %c0_i32 = arith.constant 0 : i32
    %c0_i32_0 = arith.constant 0 : i32
    %c0_i32_1 = arith.constant 0 : i32
    %c0_i32_2 = arith.constant 0 : i32
    return %c0_i32, %c0_i32_0, %c0_i32_1 : i32, i32, i32
  }
  func.func @transform_12(%arg0: i32) -> (i32, i32) {
    %c0_i32 = arith.constant 0 : i32
    %c0_i32_0 = arith.constant 0 : i32
    %c0_i32_1 = arith.constant 0 : i32
    return %c0_i32, %c0_i32_0 : i32, i32
  }
  func.func @transform_13(%arg0: i32) -> (i32, i32) {
    %c0_i32 = arith.constant 0 : i32
    %c0_i32_0 = arith.constant 0 : i32
    %c0_i32_1 = arith.constant 0 : i32
    return %c0_i32, %c0_i32_0 : i32, i32
  }
  func.func @transform_14(%arg0: i32) -> (i32, i32) {
    %c0_i32 = arith.constant 0 : i32
    %c0_i32_0 = arith.constant 0 : i32
    %c0_i32_1 = arith.constant 0 : i32
    return %c0_i32, %c0_i32_0 : i32, i32
  }
}

</mosaic_0001>

<bundles_post_ra>
// kernel: tile.7
= control target key start
LH: loop header
LB: loop body
LE: loop exit
PB: predicated region body
PF: predicated region fallthrough
CT: control target
= control target key end

     0   :  { %vm83_vm0 = vcmask 1047556   ;;  %vm85_vm1 = vcmask 261120   ;;  %vm104_vm2 = vcmask 523520   ;;  %s226_s0 = inlined_call_operand.vmem [shape: f32[2,8,2,32], index: 0, kind: input, shape index: {}]   ;;  %s227_s1 = inlined_call_operand.vmem [shape: f32[2,8,64], index: 1, kind: output, shape index: {}]  }
   0x1   :  { %v139_v0 = vld [vmem:[%s226_s0 + $0xe] sm:$0x3]  ;;  %v140_v1 = vld [vmem:[%s226_s0 + $0xc] sm:$0x3]  ;;  %v141_v2 = vld [vmem:[%s226_s0 + $0xa] sm:$0x3] }
   0x2   :  { %49 = vst [vmem:[#allocation0 + $0x38] sm:$0x3] %v139_v0  ;;  %54 = vst [vmem:[#allocation0 + $0x30] sm:$0x3] %v140_v1  ;;  %v142_v3 = vld [vmem:[%s226_s0 + $0x8] sm:$0x3] }
   0x3   :  { %59 = vst [vmem:[#allocation0 + $0x28] sm:$0x3] %v141_v2  ;;  %v143_v4 = vld [vmem:[%s226_s0 + $0x6] sm:$0x3]  ;;  %v144_v5 = vld [vmem:[%s226_s0 + $0x4] sm:$0x3] }
   0x4   :  { %64 = vst [vmem:[#allocation0 + $0x20] sm:$0x3] %v142_v3  ;;  %69 = vst [vmem:[#allocation0 + $0x18] sm:$0x3] %v143_v4  ;;  %v145_v6 = vld [vmem:[%s226_s0 + $0x2] sm:$0x3] }
   0x5   :  { %74 = vst [vmem:[#allocation0 + $0x10] sm:$0x3] %v144_v5  ;;  %v79_v7 = vld [vmem:[%s226_s0] sm:$0x3]  ;;  %78 = vst [vmem:[#allocation0 + $0x8] sm:$0x3] %v145_v6 }
   0x6   :  { %80 = vst [vmem:[#allocation0] sm:$0x3] %v79_v7  ;;  %v131_v8 = vld [vmem:[%s226_s0 + $0x1e] sm:$0x3]  ;;  %v132_v9 = vld [vmem:[%s226_s0 + $0x1c] sm:$0x3] }
   0x7   :  { %v133_v10 = vld [vmem:[%s226_s0 + $0x1a] sm:$0x3]  ;;  %9 = vst [vmem:[#allocation0 + $0x78] sm:$0x3] %v131_v8  ;;  %14 = vst [vmem:[#allocation0 + $0x70] sm:$0x3] %v132_v9 }
   0x8   :  { %19 = vst [vmem:[#allocation0 + $0x68] sm:$0x3] %v133_v10  ;;  %v134_v11 = vld [vmem:[%s226_s0 + $0x18] sm:$0x3]  ;;  %v135_v12 = vld [vmem:[%s226_s0 + $0x16] sm:$0x3] }
   0x9   :  { %v136_v13 = vld [vmem:[%s226_s0 + $0x14] sm:$0x3]  ;;  %24 = vst [vmem:[#allocation0 + $0x60] sm:$0x3] %v134_v11  ;;  %29 = vst [vmem:[#allocation0 + $0x58] sm:$0x3] %v135_v12 }
   0xa   :  { %34 = vst [vmem:[#allocation0 + $0x50] sm:$0x3] %v136_v13  ;;  %v137_v14 = vld [vmem:[%s226_s0 + $0x12] sm:$0x3]  ;;  %v138_v15 = vld [vmem:[%s226_s0 + $0x10] sm:$0x3] }
   0xb   :  { %39 = vst [vmem:[#allocation0 + $0x48] sm:$0x3] %v137_v14  ;;  %44 = vst [vmem:[#allocation0 + $0x40] sm:$0x3] %v138_v15  ;;  %s149_s0 = smov 32  }
   0xc   :  { %v99_v16 = vld [vmem:[#allocation0 + $0x1] ss:$8 sm:$0xf0]   ;;  %v82_v17 = vld [vmem:[#allocation0] ss:$8 sm:$0xf0]  }
   0xd   :  { %v97_v18 = vld [vmem:[#allocation0 + $0x1] ss:$8 sm:$0xf]   ;;  %v81_v19 = vld [vmem:[#allocation0] ss:$8 sm:$0xf]  }
   0xe   :  { %v101_v20 = vsel %vm83_vm0, %v99_v16, %v97_v18  ;;  %v84_v21 = vsel %vm83_vm0, %v82_v17, %v81_v19 }
   0xf   :  { %102 = vrot.lane.b32.xlu0 %v101_v20, %s149_s0  ;;  %86 = vst.msk [vmem:[%s227_s1] sm:$0xff] %vm85_vm1, %v84_v21  }
  0x10   :  { %v109_v22 = vld [vmem:[#allocation0 + $0x41] ss:$8 sm:$0xf0]   ;;  %v90_v23 = vld [vmem:[#allocation0 + $0x40] ss:$8 sm:$0xf0]  }
  0x12   :  { %v107_v24 = vld [vmem:[#allocation0 + $0x41] ss:$8 sm:$0xf]   ;;  %v88_v25 = vld [vmem:[#allocation0 + $0x40] ss:$8 sm:$0xf]  }
  0x13   :  { %v111_v26 = vsel %vm83_vm0, %v109_v22, %v107_v24  ;;  %v92_v27 = vsel %vm83_vm0, %v90_v23, %v88_v25 }
  0x14   :  { %146 = vst.msk [vmem:[%s227_s1 + $0x8] sm:$0xff] %vm85_vm1, %v92_v27   ;;  %112 = vrot.lane.b32.xlu0 %v111_v26, %s149_s0 }
  0x81   :  { %v103_v28 = vpop.permute.xlu0 %102  }
  0x82   :  { %105 = vst.msk [vmem:[%s227_s1] sm:$0xff] %vm104_vm2, %v103_v28  }
  0x86   :  { %v113_v29 = vpop.permute.xlu0 %112  }
  0x87   :  { %147 = vst.msk [vmem:[%s227_s1 + $0x8] sm:$0xff] %vm104_vm2, %v113_v29  }

// kernel: fused_moe_forward.1
= control target key start
LH: loop header
LB: loop body
LE: loop exit
PB: predicated region body
PF: predicated region fallthrough
CT: control target
= control target key end

     0   :  { %v1707_v2 = vmov 0   ;;  %v1708_v3 = vmov 2   ;;  %v1709_v4 = vmov 0.0   ;;  %vm1710_vm0 = vmmov 0   ;;  %s2155_s0 = inlined_call_operand.vmem [shape: f32[8,32], index: 0, kind: input, shape index: {}]   ;;  %s2156_s1 = inlined_call_operand.vmem [shape: f32[2,8,4], index: 1, kind: input, shape index: {}]   ;;  %s2157_s2 = inlined_call_operand.vmem [shape: f32[2,8,64], index: 2, kind: input, shape index: {}]   ;;  %s2158_s3 = inlined_call_operand.vmem [shape: f32[2,8,32], index: 3, kind: input, shape index: {}]   ;;  %s2159_s4 = inlined_call_operand.vmem [shape: f32[2,8,1], index: 4, kind: input, shape index: {}]   ;;  %s2160_s5 = inlined_call_operand.vmem [shape: f32[2,4,32], index: 5, kind: input, shape index: {}]   ;;  %s2161_s6 = inlined_call_operand.vmem [shape: bf16[2,32,128], index: 6, kind: input, shape index: {}]   ;;  %s2162_s7 = inlined_call_operand.vmem [shape: bf16[2,32,64], index: 7, kind: input, shape index: {}]   ;;  %s2163_s8 = inlined_call_operand.vmem [shape: bf16[2,64,128], index: 8, kind: input, shape index: {}]   ;;  %s2164_s9 = inlined_call_operand.vmem [shape: bf16[2,64,32], index: 9, kind: input, shape index: {}]   ;;  %s2165_s10 = inlined_call_operand.vmem [shape: bf16[2,64,32], index: 10, kind: input, shape index: {}]   ;;  %s2166_s11 = inlined_call_operand.vmem [shape: bf16[2,32,32], index: 11, kind: input, shape index: {}]   ;;  %s2167_s12 = inlined_call_operand.vmem [shape: bf16[32,128], index: 12, kind: input, shape index: {}]   ;;  %s2168_s13 = inlined_call_operand.vmem [shape: bf16[64,32], index: 13, kind: input, shape index: {}]   ;;  %s2169_s14 = inlined_call_operand.hbm [shape: f32[8,32], index: 14, kind: output, shape index: {}]  }
   0x1   :  { %v132_v0 = vld [vmem:[%s2156_s1] sm:$0xff]  ;;  %v1619_v1 = vld [vmem:[%s2167_s12 + $0x8] sm:$0xff]   ;;  %1609 = vset.pattern.permute.xlu0 %v1707_v2  ;;  %1611 = vset.pattern.permute.xlu1 %v1708_v3  ;;  %v1711_v7 = vmov 1   ;;  %v1712_v8 = vmov 3   ;;  %vm67_vm2 = vcmask 261120  }
   0x2   :  { %152 = vperm.xlu0 %1609, %v132_v0   ;;  %172 = vperm.xlu1 %1611, %v132_v0   ;;  %v1620_v5 = vld [vmem:[%s2167_s12] sm:$0xff]   ;;  %v1622_v9 = vld [vmem:[%s2161_s6 + $0x8] sm:$0xff]  }
   0x3   :  { %1456 = vmatprep.subr.bf16.mxu0 %v1709_v4  ;;  %1460 = vmatprep.mubr.msk.bf16.mxu0 %vm1710_vm0, %v1709_v4  ;;  %v1808_v6 = vld [vmem:[%s2155_s0] sm:$0xff]  ;;  %v1621_v12 = vld [vmem:[%s2162_s7 + $0x8] sm:$0xff]  }
   0x4   :  { %1457 = vmatpush3.bf16.msra.mxu0 %v1619_v1  ;;  %1464 = vmatprep.subr.bf16.mxu1 %v1709_v4  ;;  %v1822_v10 = vld [vmem:[%s2159_s4] sm:$0xff]  ;;  %v50_v11 = vpack.c.bf16 %v1808_v6, %v1808_v6 }
   0x5   :  { %1458 = vmatprep.subr.bf16.mxu0 %v1709_v4  ;;  %1468 = vmatprep.mubr.msk.bf16.mxu1 %vm1710_vm0, %v1709_v4  ;;  %vm135_vm1 = vcmp.ne.f32.partialorder %v1822_v10, 0.0  ;;  %v1624_v13 = vld [vmem:[%s2161_s6] sm:$0xff]  }
   0x6   :  { %1610 = vset.pattern.permute.xlu0 %v1711_v7  ;;  %1612 = vset.pattern.permute.xlu1 %v1712_v8  ;;  %v1302_v14 = vsel %vm135_vm1, 1.0, %v1709_v4  ;;  %v1623_v15 = vld [vmem:[%s2162_s7] sm:$0xff]  }
   0x7   :  { %162 = vperm.xlu0 %1610, %v132_v0   ;;  %182 = vperm.xlu1 %1612, %v132_v0  }
   0x8   :  { %1459 = vmatpush3.bf16.msra.mxu0 %v1620_v5  ;;  %1465 = vmatpush3.bf16.msra.mxu1 %v1622_v9 }
   0x9   :  { %1472 = vmatprep.subr.bf16.mxu0 %v1709_v4  ;;  %1466 = vmatprep.subr.bf16.mxu1 %v1709_v4 }
   0xb   :  { %1461 = vmatmul.mubr.msk.bf16.vlgmr.msra.gmra.mxu0 %vm67_vm2, %v50_v11  ;;  %1613 = vset.pattern.permute.xlu0 %v1707_v2 }
   0xc   :  { %1473 = vmatpush3.bf16.msra.mxu0 %v1621_v12  ;;  %1467 = vmatpush3.bf16.msra.mxu1 %v1624_v13 }
   0xd   :  { %1474 = vmatprep.subr.bf16.mxu0 %v1709_v4  ;;  %1476 = vmatprep.mubr.msk.bf16.mxu0 %vm1710_vm0, %v1709_v4 }
   0xe   :  { %389 = vperm.xlu0 %1613, %v1302_v14   ;;  %1480 = vmatprep.subr.bf16.mxu1 %v1709_v4 }
   0xf   :  { %1617 = vset.pattern.permute.xlu1 %v1707_v2 }
  0x10   :  { %1475 = vmatpush3.bf16.msra.mxu0 %v1623_v15 }
  0x11   :  { %1492 = vmatprep.subr.bf16.mxu0 %v1709_v4 }
  0x12   :  { %19 = vsyncpa [#allocation3], 0  ;;  %vm138_vm3 = vcmask 7168   ;;  %v155_v17 = vlaneseq  ;;  %v134_v20 = vld [vmem:[%s2160_s5] sm:$0xf]  ;;  %v1625_v40 = vld [vmem:[%s2163_s8 + $0x18] sm:$0xff]  }
  0x13   :  { %v139_v16 = vsel %vm138_vm3, %v1302_v14, 0.0  ;;  %v1626_v42 = vld [vmem:[%s2163_s8 + $0x10] sm:$0xff]   ;;  %v1627_v50 = vld [vmem:[%s2163_s8 + $0x8] sm:$0xff]   ;;  %s1713_s12 = smov 64   ;;  %v1628_v53 = vld [vmem:[%s2163_s8] sm:$0xff]   ;;  %vm342_vm4 = vcmask 523264  }
  0x14   :  { %v1848_v18 = vshrl.u32 %v155_v17, 7  ;;  %v1895_v56 = vld [vmem:[%s2156_s1 + $0x8] sm:$0xff]  ;;  %v307_v57 = vld [vmem:[%s2157_s2] sm:$0xff]  ;;  %v1630_v11 = vld [vmem:[%s2165_s10 + $0x18] sm:$0xff]   ;;  %s1714_s22 = smov 1.0  }
  0x15   :  { %758 = vperm.xlu0 %1613, %v1895_v56   ;;  %v1631_v12 = vld [vmem:[%s2164_s9 + $0x10] sm:$0xff]   ;;  %v1633_v14 = vld [vmem:[%s2164_s9 + $0x8] sm:$0xff]  }
  0x16   :  { %v157_v19 = vsub.s32 0, %v1848_v18  ;;  %v167_v22 = vsub.s32 1, %v1848_v18  ;;  %v177_v24 = vsub.s32 2, %v1848_v18  ;;  %v187_v26 = vsub.s32 3, %v1848_v18  ;;  %v1632_v13 = vld [vmem:[%s2165_s10 + $0x10] sm:$0xff]   ;;  %v1634_v15 = vld [vmem:[%s2165_s10 + $0x8] sm:$0xff]  }
  0x18   :  { %v158_v21 = vrot.slane %v134_v20, %v157_v19  ;;  %v168_v28 = vrot.slane %v134_v20, %v167_v22  ;;  %v178_v29 = vrot.slane %v134_v20, %v177_v24  ;;  %v188_v30 = vrot.slane %v134_v20, %v187_v26 }
  0x19   :  { %1614 = vset.pattern.permute.xlu0 %v1711_v7  ;;  %v1629_v7 = vld [vmem:[%s2164_s9 + $0x18] sm:$0xff]  }
  0x2b   :  { %140 = vadd.xlane.f32.xlu1 %v139_v16 }
  0x7d   :  { %v153_v23 = vpop.permute.xlu0 %152  ;;  %v173_v25 = vpop.permute.xlu1 %172 }
  0x7e   :  { %v159_v27 = vmul.f32 %v158_v21, %v153_v23  ;;  %v179_v35 = vmul.f32 %v178_v29, %v173_v25 }
  0x80   :  { %v160_v33 = vadd.f32 %v159_v27, %v1808_v6 }
  0x82   :  { %v163_v31 = vpop.permute.xlu0 %162  ;;  %v183_v32 = vpop.permute.xlu1 %182 }
  0x83   :  { %v169_v34 = vmul.f32 %v168_v28, %v163_v31  ;;  %v189_v37 = vmul.f32 %v188_v30, %v183_v32 }
  0x85   :  { %v170_v36 = vadd.f32 %v169_v34, %v160_v33 }
  0x87   :  { %v180_v38 = vadd.f32 %v179_v35, %v170_v36 }
  0x89   :  { %v190_v39 = vadd.f32 %v189_v37, %v180_v38  ;;  %v1933_v23 = vpop.permute.xlu0 %389 }
  0x8b   :  { %v191_v41 = vpack.c.bf16 %v190_v39, %v190_v39 }
  0x8d   :  { %1469 = vmatmul.mubr.msk.bf16.vlgmr.msra.gmra.mxu1 %vm67_vm2, %v191_v41  ;;  %1477 = vmatmul.mubr.msk.bf16.vlgmr.msra.gmra.mxu0 %vm67_vm2, %v191_v41 }
  0x8e   :  { %1481 = vmatpush3.bf16.msra.mxu1 %v1625_v40  ;;  %1488 = vmatprep.mubr.msk.bf16.mxu1 %vm1710_vm0, %v1709_v4 }
  0x8f   :  { %1482 = vmatprep.subr.bf16.mxu1 %v1709_v4  ;;  %1500 = vmatprep.mubr.msk.bf16.mxu0 %vm1710_vm0, %v1709_v4 }
  0x90   :  { %1493 = vmatpush3.bf16.msra.mxu0 %v1629_v7 }
  0x91   :  { %1494 = vmatprep.subr.bf16.mxu0 %v1709_v4 }
  0x92   :  { %1483 = vmatpush3.bf16.msra.mxu1 %v1626_v42 }
  0x93   :  { %1484 = vmatprep.subr.bf16.mxu1 %v1709_v4 }
  0x94   :  { %1495 = vmatpush3.bf16.msra.mxu0 %v1631_v12 }
  0x95   :  { %1496 = vmatprep.subr.bf16.mxu0 %v1709_v4 }
  0x96   :  { %1485 = vmatpush3.bf16.msra.mxu1 %v1627_v50 }
  0x97   :  { %1486 = vmatprep.subr.bf16.mxu1 %v1709_v4 }
  0x98   :  { %1497 = vmatpush3.bf16.msra.mxu0 %v1633_v14 }
  0x99   :  { %1498 = vmatprep.subr.bf16.mxu0 %v1709_v4 }
  0x9a   :  { %1487 = vmatpush3.bf16.msra.mxu1 %v1628_v53 }
  0x9b   :  { %1504 = vmatprep.subr.bf16.mxu1 %v1709_v4 }
  0xb4   :  { %v141_v43 = vpop.xlane.xlu1 %140 }
  0xb5   :  { %v142_v44 = vrot.slane %v141_v43, 4 }
  0xb7   :  { %v143_v45 = vadd.f32 %v142_v44, %v141_v43 }
  0xb9   :  { %v144_v46 = vrot.slane %v143_v45, 2 }
  0xbb   :  { %v145_v47 = vadd.f32 %v144_v46, %v143_v45  ;;  %v1635_v45 = vld [vmem:[%s2164_s9] sm:$0xff]  }
  0xbc   :  { %v1636_v46 = vld [vmem:[%s2165_s10] sm:$0xff]   ;;  %1499 = vmatpush3.bf16.msra.mxu0 %v1635_v45  ;;  %v1643_v45 = vld [vmem:[%s2168_s13 + $0x18] sm:$0xff]  }
  0xbd   :  { %v146_v48 = vrot.slane %v145_v47, 1  ;;  %1516 = vmatprep.subr.bf16.mxu0 %v1709_v4 }
  0xbf   :  { %v147_v49 = vadd.f32 %v146_v48, %v145_v47 }
  0xc1   :  { %1596 = vpush %v147_v49 }
  0xcb   :  { %v1884_v51 = vpop.f32.mrf.mxu0 }
  0xcc   :  { %119 = vrot.lane.b32.xlu1 %v1884_v51, %s1713_s12 }
  0xcd   :  { %v1462_v52 = vpop.f32.mrf.mxu0 }
  0xcf   :  { %v108_v54 = vpop.f32.mrf.mxu0 }
  0xd0   :  { %v1955_v54 = vld [vmem:[%s2159_s4 + $0x8] sm:$0xff] }
  0xd1   :  { %v1463_v55 = vpop.f32.mrf.mxu0  ;;  %vm742_vm5 = vcmp.ne.f32.partialorder %v1955_v54, 0.0 }
  0xd2   :  { %v1336_v55 = vsel %vm742_vm5, 1.0, %v1709_v4 }
  0xd3   :  { %998 = vperm.xlu1 %1617, %v1336_v55  }
  0xf2   :  { %s1597_s21 = spop %1596 }
  0xf3   :  { %s149_s0 = smax.f32 %s1714_s22, %s1597_s21 }
  0xf4   :  { %v399_v16 = vstv %s149_s0 }
  0xf5   :  { %1661 = vrcp.f32 %v399_v16 }
 0x102   :  { %v1937_v39 = vpop.eup %1661 }
 0x14d   :  { %v1902_v58 = vpop.f32.mrf.mxu1  ;;  %v301_v59 = vpop.f32.mrf.mxu0 }
 0x14e   :  { %v308_v60 = vmul.f32 %v307_v57, %v301_v59  ;;  %v386_v20 = vand.u32 2147483647, %v1902_v58  ;;  %v745_v57 = vsel %vm138_vm3, %v1336_v55, 0.0  ;;  %v1645_v55 = vld [vmem:[%s2168_s13 + $0x8] sm:$0xff]  }
 0x14f   :  { %v1470_v61 = vpop.f32.mrf.mxu1  ;;  %v1478_v62 = vpop.f32.mrf.mxu0 }
 0x150   :  { %v309_v63 = vpack.c.bf16 %v308_v60, %v308_v60  ;;  %v392_v29 = vmul.f32 %v1933_v23, %v386_v20  ;;  %v759_v62 = vpop.permute.xlu0 %758 }
 0x151   :  { %v248_v0 = vpop.f32.mrf.mxu1  ;;  %v304_v1 = vpop.f32.mrf.mxu0 }
 0x152   :  { %1489 = vmatmul.mubr.msk.bf16.vlgmr.msra.gmra.mxu1 %vm342_vm4, %v309_v63  ;;  %v393_v33 = vrot.slane %v392_v29, 4  ;;  %v1638_v1 = vld [vmem:[%s2161_s6 + $0x10] sm:$0xff]  }
 0x153   :  { %v1471_v5 = vpop.f32.mrf.mxu1  ;;  %v1479_v9 = vpop.f32.mrf.mxu0  ;;  %1512 = vmatprep.mubr.msk.bf16.mxu1 %vm1710_vm0, %v1709_v4  ;;  %1505 = vmatpush3.bf16.msra.mxu1 %v1630_v11 }
 0x154   :  { %1506 = vmatprep.subr.bf16.mxu1 %v1709_v4  ;;  %v394_v36 = vadd.f32 %v393_v33, %v392_v29  ;;  %v1335_v5 = vld [vmem:[%s2160_s5 + $0x4] sm:$0xf] }
 0x155   :  { %v764_v9 = vrot.slane %v1335_v5, %v157_v19  ;;  %v774_v11 = vrot.slane %v1335_v5, %v167_v22  ;;  %v794_v20 = vrot.slane %v1335_v5, %v187_v26  ;;  %v1639_v22 = vld [vmem:[%s2162_s7 + $0x18] sm:$0xff]  }
 0x156   :  { %v395_v40 = vrot.slane %v394_v36, 2 }
 0x157   :  { %1507 = vmatpush3.bf16.msra.mxu1 %v1632_v13  ;;  %v765_v12 = vmul.f32 %v764_v9, %v759_v62  ;;  %v784_v13 = vrot.slane %v1335_v5, %v177_v24  ;;  %v1642_v24 = vld [vmem:[%s2166_s11] sm:$0xff]  }
 0x158   :  { %1508 = vmatprep.subr.bf16.mxu1 %v1709_v4  ;;  %v396_v43 = vadd.f32 %v395_v40, %v394_v36 }
 0x159   :  { %v766_v16 = vadd.f32 %v765_v12, %v1808_v6  ;;  %v1640_v6 = vld [vmem:[%s2162_s7 + $0x10] sm:$0xff]  }
 0x15a   :  { %v397_v44 = vrot.slane %v396_v43, 1 }
 0x15b   :  { %1509 = vmatpush3.bf16.msra.mxu1 %v1634_v15 }
 0x15c   :  { %1510 = vmatprep.subr.bf16.mxu1 %v1709_v4  ;;  %v398_v47 = vadd.f32 %v397_v44, %v396_v43 }
 0x15e   :  { %v401_v48 = vmul.f32 %v1937_v39, %v398_v47 }
 0x15f   :  { %1511 = vmatpush3.bf16.msra.mxu1 %v1636_v46 }
 0x160   :  { %1536 = vmatprep.subr.bf16.mxu1 %v1709_v4 }
 0x212   :  { %v380_v17 = vpop.f32.mrf.mxu1 }
 0x213   :  { %v402_v21 = vand.u32 2147483647, %v380_v17 }
 0x214   :  { %v1490_v25 = vpop.f32.mrf.mxu1 }
 0x215   :  { %v403_v27 = vmul.f32 %v402_v21, %v1933_v23 }
 0x216   :  { %v383_v28 = vpop.f32.mrf.mxu1 }
 0x217   :  { %v404_v30 = vrot.slane %v403_v27, 4 }
 0x218   :  { %v1491_v31 = vpop.f32.mrf.mxu1 }
 0x219   :  { %v405_v32 = vadd.f32 %v404_v30, %v403_v27 }
 0x21b   :  { %v406_v34 = vrot.slane %v405_v32, 2 }
 0x21d   :  { %v407_v35 = vadd.f32 %v406_v34, %v405_v32 }
 0x21f   :  { %v408_v37 = vrot.slane %v407_v35, 1 }
 0x221   :  { %v409_v38 = vadd.f32 %v408_v37, %v407_v35  ;;  %v1301_v35 = vmul.f32 -1.442695, %v1884_v51 }
 0x223   :  { %v410_v41 = vmul.f32 %v1937_v39, %v409_v38  ;;  %v576_v38 = vld [vmem:[%s2158_s3] sm:$0xff] }
 0x225   :  { %v411_v42 = vadd.f32 1e-08, %v410_v41 }
 0x227   :  { %1663 = vrcp.f32 %v411_v42 }
 0x234   :  { %v1664_v49 = vpop.eup %1663 }
 0x235   :  { %v413_v50 = vmul.f32 %v1664_v49, %v401_v48 }
 0x237   :  { %v414_v52 = vmul.f32 %v413_v50, %v380_v17 }
 0x239   :  { %v415_v53 = vadd.f32 %v414_v52, %v1902_v58  ;;  %v1644_v52 = vld [vmem:[%s2168_s13 + $0x10] sm:$0xff]  }
 0x23b   :  { %424 = vrot.lane.b32.xlu0 %v415_v53, %s1713_s12  ;;  %v1314_v58 = vmul.f32 -1.442695, %v415_v53 }
 0x23d   :  { %1665 = vpow2.f32 %v1314_v58  ;;  %v120_v58 = vpop.permute.xlu1 %119 }
 0x23f   :  { %768 = vperm.xlu0 %1614, %v1895_v56  }
 0x243   :  { %1615 = vset.pattern.permute.xlu0 %v1708_v3 }
 0x244   :  { %778 = vperm.xlu0 %1615, %v1895_v56  }
 0x248   :  { %1616 = vset.pattern.permute.xlu0 %v1712_v8  ;;  %v1637_v8 = vld [vmem:[%s2161_s6 + $0x18] sm:$0xff]  }
 0x249   :  { %788 = vperm.xlu0 %1616, %v1895_v56  }
 0x24a   :  { %v1666_v59 = vpop.eup %1665 }
 0x24b   :  { %v419_v60 = vadd.f32 1.0, %v1666_v59  ;;  %v1646_v59 = vld [vmem:[%s2168_s13] sm:$0xff]  }
 0x24d   :  { %1618 = vset.pattern.permute.xlu0 %v1707_v2  ;;  %1667 = vrcp.f32 %v419_v60  ;;  %v1641_v2 = vld [vmem:[%s2166_s11 + $0x8] sm:$0xff]  }
 0x24e   :  { %1669 = vpow2.f32 %v1301_v35 }
 0x25a   :  { %v1668_v61 = vpop.eup %1667 }
 0x25b   :  { %v422_v3 = vmul.f32 %v1668_v61, %v415_v53  ;;  %v1670_v36 = vpop.eup %1669  ;;  %v1647_v61 = vld [vmem:[%s2163_s8 + $0x38] sm:$0xff]  }
 0x25c   :  { %v114_v37 = vadd.f32 1.0, %v1670_v36 }
 0x25e   :  { %1671 = vrcp.f32 %v114_v37 }
 0x268   :  { %746 = vadd.xlane.f32.xlu0 %v745_v57 }
 0x26b   :  { %v1672_v53 = vpop.eup %1671 }
 0x26c   :  { %v117_v57 = vmul.f32 %v1672_v53, %v1884_v51  ;;  %v1648_v51 = vld [vmem:[%s2163_s8 + $0x30] sm:$0xff]  }
 0x26e   :  { %v122_v60 = vmul.f32 %v120_v58, %v117_v57  ;;  %v1657_v57 = vld [vmem:[%s2164_s9 + $0x20] sm:$0xff]  }
 0x26f   :  { %v1658_v58 = vld [vmem:[%s2165_s10 + $0x20] sm:$0xff]  }
 0x270   :  { %v123_v62 = vpack.c.bf16 %v122_v60, %v122_v60 }
 0x2ad   :  { %v425_v63 = vpop.permute.xlu0 %424 }
 0x2ae   :  { %v427_v0 = vmul.f32 %v425_v63, %v422_v3  ;;  %v1649_v63 = vld [vmem:[%s2163_s8 + $0x28] sm:$0xff]  }
 0x2b0   :  { %v428_v56 = vpack.c.bf16 %v427_v0, %v427_v0 }
 0x2b2   :  { %1501 = vmatmul.mubr.msk.bf16.vlgmr.msra.gmra.mxu0 %vm342_vm4, %v428_v56  ;;  %1513 = vmatmul.mubr.msk.bf16.vlgmr.msra.gmra.mxu1 %vm342_vm4, %v428_v56  ;;  %v1650_v56 = vld [vmem:[%s2163_s8 + $0x20] sm:$0xff]  }
 0x2b3   :  { %1537 = vmatpush3.bf16.msra.mxu1 %v1637_v8  ;;  %1540 = vmatprep.mubr.msk.bf16.mxu1 %vm1710_vm0, %v1709_v4 }
 0x2b4   :  { %1538 = vmatprep.subr.bf16.mxu1 %v1709_v4  ;;  %1517 = vmatpush3.bf16.msra.mxu0 %v1641_v2 }
 0x2b5   :  { %1518 = vmatprep.subr.bf16.mxu0 %v1709_v4  ;;  %1520 = vmatprep.mubr.msk.bf16.mxu0 %vm1710_vm0, %v1709_v4 }
 0x2b7   :  { %1539 = vmatpush3.bf16.msra.mxu1 %v1638_v1  ;;  %v1351_v1 = vld [vmem:[%s2157_s2 + $0x8] sm:$0xff] }
 0x2b8   :  { %1544 = vmatprep.subr.bf16.mxu1 %v1709_v4  ;;  %1519 = vmatpush3.bf16.msra.mxu0 %v1642_v24 }
 0x2b9   :  { %1524 = vmatprep.subr.bf16.mxu0 %v1709_v4 }
 0x2ba   :  { %v769_v7 = vpop.permute.xlu0 %768 }
 0x2bb   :  { %v775_v14 = vmul.f32 %v774_v11, %v769_v7 }
 0x2bd   :  { %v776_v21 = vadd.f32 %v775_v14, %v766_v16  ;;  %v1651_v14 = vld [vmem:[%s2164_s9 + $0x38] sm:$0xff]   ;;  %v1653_v16 = vld [vmem:[%s2164_s9 + $0x30] sm:$0xff]  }
 0x2bf   :  { %v779_v15 = vpop.permute.xlu0 %778 }
 0x2c0   :  { %v785_v17 = vmul.f32 %v784_v13, %v779_v15  ;;  %v1652_v15 = vld [vmem:[%s2165_s10 + $0x38] sm:$0xff]  }
 0x2c2   :  { %v786_v27 = vadd.f32 %v785_v17, %v776_v21  ;;  %v1654_v17 = vld [vmem:[%s2165_s10 + $0x30] sm:$0xff]   ;;  %v1656_v21 = vld [vmem:[%s2165_s10 + $0x28] sm:$0xff]  }
 0x2c4   :  { %v789_v25 = vpop.permute.xlu0 %788 }
 0x2c5   :  { %v795_v19 = vmul.f32 %v794_v20, %v789_v25  ;;  %v1655_v20 = vld [vmem:[%s2164_s9 + $0x28] sm:$0xff]  }
 0x2c7   :  { %v796_v28 = vadd.f32 %v795_v19, %v786_v27 }
 0x2c9   :  { %v797_v29 = vpack.c.bf16 %v796_v28, %v796_v28 }
 0x2cb   :  { %1541 = vmatmul.mubr.msk.bf16.vlgmr.msra.gmra.mxu1 %vm67_vm2, %v797_v29 }
 0x2cc   :  { %1545 = vmatpush3.bf16.msra.mxu1 %v1639_v22  ;;  %1548 = vmatprep.mubr.msk.bf16.mxu1 %vm1710_vm0, %v1709_v4 }
 0x2cd   :  { %1546 = vmatprep.subr.bf16.mxu1 %v1709_v4 }
 0x2d0   :  { %1547 = vmatpush3.bf16.msra.mxu1 %v1640_v6 }
 0x2d1   :  { %1564 = vmatprep.subr.bf16.mxu1 %v1709_v4 }
 0x2d3   :  { %1549 = vmatmul.mubr.msk.bf16.vlgmr.msra.gmra.mxu1 %vm67_vm2, %v797_v29 }
 0x2d4   :  { %1572 = vmatprep.mubr.msk.bf16.mxu1 %vm1710_vm0, %v1709_v4  ;;  %1565 = vmatpush3.bf16.msra.mxu1 %v1651_v14 }
 0x2d5   :  { %1566 = vmatprep.subr.bf16.mxu1 %v1709_v4 }
 0x2d8   :  { %1567 = vmatpush3.bf16.msra.mxu1 %v1653_v16 }
 0x2d9   :  { %1568 = vmatprep.subr.bf16.mxu1 %v1709_v4 }
 0x2dc   :  { %1569 = vmatpush3.bf16.msra.mxu1 %v1655_v20 }
 0x2dd   :  { %1570 = vmatprep.subr.bf16.mxu1 %v1709_v4 }
 0x2e0   :  { %1571 = vmatpush3.bf16.msra.mxu1 %v1657_v57 }
 0x2e1   :  { %1588 = vmatprep.subr.bf16.mxu1 %v1709_v4 }
 0x2f1   :  { %v747_v18 = vpop.xlane.xlu0 %746 }
 0x2f2   :  { %v748_v26 = vrot.slane %v747_v18, 4 }
 0x2f4   :  { %v749_v30 = vadd.f32 %v748_v26, %v747_v18 }
 0x2f6   :  { %v750_v31 = vrot.slane %v749_v30, 2 }
 0x2f8   :  { %v751_v32 = vadd.f32 %v750_v31, %v749_v30 }
 0x2fa   :  { %v752_v33 = vrot.slane %v751_v32, 1 }
 0x2fc   :  { %v753_v34 = vadd.f32 %v752_v33, %v751_v32  ;;  %v2096_v32 = vpop.permute.xlu1 %998 }
 0x2fe   :  { %1598 = vpush %v753_v34 }
 0x32f   :  { %s1599_s28 = spop %1598 }
 0x330   :  { %s755_s29 = smax.f32 %s1714_s22, %s1599_s28 }
 0x331   :  { %v1008_v24 = vstv %s755_s29 }
 0x332   :  { %1673 = vrcp.f32 %v1008_v24 }
 0x372   :  { %v2017_v40 = vpop.f32.mrf.mxu0  ;;  %v570_v41 = vpop.f32.mrf.mxu1 }
 0x373   :  { %v577_v42 = vmul.f32 %v576_v38, %v570_v41  ;;  %v638_v24 = vand.u32 2147483647, %v2017_v40 }
 0x374   :  { %v1502_v43 = vpop.f32.mrf.mxu0  ;;  %v1514_v44 = vpop.f32.mrf.mxu1 }
 0x375   :  { %v578_v46 = vpack.c.bf16 %v577_v42, %v577_v42 }
 0x376   :  { %v501_v47 = vpop.f32.mrf.mxu0  ;;  %v573_v48 = vpop.f32.mrf.mxu1 }
 0x377   :  { %1521 = vmatmul.mubr.msk.bf16.vlgmr.msra.gmra.mxu0 %vm67_vm2, %v578_v46  ;;  %v2100_v48 = vpop.eup %1673 }
 0x378   :  { %1525 = vmatpush3.bf16.msra.mxu0 %v1643_v45  ;;  %v1503_v49 = vpop.f32.mrf.mxu0  ;;  %v1515_v50 = vpop.f32.mrf.mxu1  ;;  %1532 = vmatprep.mubr.msk.bf16.mxu0 %vm1710_vm0, %v1709_v4 }
 0x379   :  { %1526 = vmatprep.subr.bf16.mxu0 %v1709_v4 }
 0x37c   :  { %1527 = vmatpush3.bf16.msra.mxu0 %v1644_v52 }
 0x37d   :  { %1528 = vmatprep.subr.bf16.mxu0 %v1709_v4 }
 0x380   :  { %1529 = vmatpush3.bf16.msra.mxu0 %v1645_v55 }
 0x381   :  { %1530 = vmatprep.subr.bf16.mxu0 %v1709_v4 }
 0x384   :  { %1531 = vmatpush3.bf16.msra.mxu0 %v1646_v59 }
 0x385   :  { %1552 = vmatprep.subr.bf16.mxu0 %v1709_v4 }
 0x387   :  { %1533 = vmatmul.mubr.msk.bf16.vlgmr.msra.gmra.mxu0 %vm342_vm4, %v123_v62 }
 0x388   :  { %1553 = vmatpush3.bf16.msra.mxu0 %v1647_v61  ;;  %1560 = vmatprep.mubr.msk.bf16.mxu0 %vm1710_vm0, %v1709_v4 }
 0x389   :  { %1554 = vmatprep.subr.bf16.mxu0 %v1709_v4 }
 0x38b   :  { %v2049_v3 = vpop.f32.mrf.mxu1 }
 0x38c   :  { %1555 = vmatpush3.bf16.msra.mxu0 %v1648_v51  ;;  %v995_v30 = vand.u32 2147483647, %v2049_v3 }
 0x38d   :  { %v1542_v0 = vpop.f32.mrf.mxu1  ;;  %1556 = vmatprep.subr.bf16.mxu0 %v1709_v4 }
 0x38e   :  { %v1001_v36 = vmul.f32 %v2096_v32, %v995_v30  ;;  %v639_v30 = vmul.f32 %v638_v24, %v1933_v23 }
 0x38f   :  { %v855_v8 = vpop.f32.mrf.mxu1 }
 0x390   :  { %1557 = vmatpush3.bf16.msra.mxu0 %v1649_v63  ;;  %v1002_v42 = vrot.slane %v1001_v36, 4 }
 0x391   :  { %v1543_v2 = vpop.f32.mrf.mxu1  ;;  %1558 = vmatprep.subr.bf16.mxu0 %v1709_v4 }
 0x392   :  { %v1003_v45 = vadd.f32 %v1002_v42, %v1001_v36 }
 0x393   :  { %v909_v5 = vpop.f32.mrf.mxu1 }
 0x394   :  { %v917_v9 = vmul.f32 %v1351_v1, %v909_v5  ;;  %1559 = vmatpush3.bf16.msra.mxu0 %v1650_v56  ;;  %v1004_v49 = vrot.slane %v1003_v45, 2 }
 0x395   :  { %v1550_v7 = vpop.f32.mrf.mxu1  ;;  %1576 = vmatprep.subr.bf16.mxu0 %v1709_v4 }
 0x396   :  { %v918_v11 = vpack.c.bf16 %v917_v9, %v917_v9  ;;  %v1005_v53 = vadd.f32 %v1004_v49, %v1003_v45  ;;  %v1659_v7 = vld [vmem:[%s2166_s11 + $0x18] sm:$0xff]  }
 0x397   :  { %v912_v12 = vpop.f32.mrf.mxu1 }
 0x398   :  { %1561 = vmatmul.mubr.msk.bf16.vlgmr.msra.gmra.mxu0 %vm342_vm4, %v918_v11  ;;  %v1006_v55 = vrot.slane %v1005_v53, 1 }
 0x399   :  { %v1551_v13 = vpop.f32.mrf.mxu1  ;;  %1584 = vmatprep.mubr.msk.bf16.mxu0 %vm1710_vm0, %v1709_v4  ;;  %1577 = vmatpush3.bf16.msra.mxu0 %v1652_v15 }
 0x39a   :  { %1578 = vmatprep.subr.bf16.mxu0 %v1709_v4  ;;  %v1007_v59 = vadd.f32 %v1006_v55, %v1005_v53 }
 0x39c   :  { %v1010_v60 = vmul.f32 %v2100_v48, %v1007_v59 }
 0x39d   :  { %1579 = vmatpush3.bf16.msra.mxu0 %v1654_v17 }
 0x39e   :  { %1580 = vmatprep.subr.bf16.mxu0 %v1709_v4 }
 0x3a1   :  { %1581 = vmatpush3.bf16.msra.mxu0 %v1656_v21 }
 0x3a2   :  { %1582 = vmatprep.subr.bf16.mxu0 %v1709_v4 }
 0x3a5   :  { %1583 = vmatpush3.bf16.msra.mxu0 %v1658_v58 }
 0x437   :  { %v2090_v25 = vpop.f32.mrf.mxu0 }
 0x439   :  { %v1522_v27 = vpop.f32.mrf.mxu0 }
 0x43a   :  { %v648_v27 = vand.u32 2147483647, %v2090_v25 }
 0x43b   :  { %v635_v19 = vpop.f32.mrf.mxu0 }
 0x43c   :  { %v649_v19 = vmul.f32 %v648_v27, %v1933_v23 }
 0x43d   :  { %v1523_v28 = vpop.f32.mrf.mxu0 }
 0x43e   :  { %v650_v28 = vsel %vm67_vm2, %v649_v19, 0.0 }
 0x447   :  { %v2092_v22 = vpop.f32.mrf.mxu0 }
 0x449   :  { %v1534_v29 = vpop.f32.mrf.mxu0 }
 0x44a   :  { %v651_v29 = vrot.slane %v650_v28, 4 }
 0x44b   :  { %v733_v6 = vpop.f32.mrf.mxu0 }
 0x44c   :  { %v652_v6 = vadd.f32 %v651_v29, %v650_v28 }
 0x44d   :  { %v1535_v18 = vpop.f32.mrf.mxu0 }
 0x44e   :  { %v653_v18 = vrot.slane %v652_v6, 2 }
 0x458   :  { %v989_v26 = vpop.f32.mrf.mxu0 }
 0x459   :  { %v1011_v31 = vand.u32 2147483647, %v989_v26 }
 0x45a   :  { %v1562_v33 = vpop.f32.mrf.mxu0 }
 0x45b   :  { %v1012_v34 = vmul.f32 %v1011_v31, %v2096_v32  ;;  %v640_v33 = vsel %vm67_vm2, %v639_v30, 0.0 }
 0x45c   :  { %v992_v35 = vpop.f32.mrf.mxu0 }
 0x45d   :  { %v1013_v37 = vrot.slane %v1012_v34, 4 }
 0x45e   :  { %v1563_v38 = vpop.f32.mrf.mxu0 }
 0x45f   :  { %v1014_v41 = vadd.f32 %v1013_v37, %v1012_v34  ;;  %v641_v38 = vrot.slane %v640_v33, 4 }
 0x461   :  { %v1015_v43 = vrot.slane %v1014_v41, 2  ;;  %v642_v23 = vadd.f32 %v641_v38, %v640_v33 }
 0x463   :  { %v1016_v44 = vadd.f32 %v1015_v43, %v1014_v41  ;;  %v643_v55 = vrot.slane %v642_v23, 2 }
 0x465   :  { %v1017_v46 = vrot.slane %v1016_v44, 1 }
 0x467   :  { %v1018_v47 = vadd.f32 %v1017_v46, %v1016_v44 }
 0x469   :  { %v1019_v50 = vmul.f32 %v2100_v48, %v1018_v47 }
 0x46b   :  { %v1020_v52 = vadd.f32 1e-08, %v1019_v50 }
 0x46d   :  { %1675 = vrcp.f32 %v1020_v52 }
 0x47a   :  { %v1676_v61 = vpop.eup %1675 }
 0x47b   :  { %v1022_v62 = vmul.f32 %v1676_v61, %v1010_v60  ;;  %v644_v60 = vadd.f32 %v643_v55, %v642_v23 }
 0x47d   :  { %v1023_v51 = vmul.f32 %v1022_v62, %v989_v26  ;;  %v654_v26 = vadd.f32 %v653_v18, %v652_v6 }
 0x47f   :  { %v1024_v63 = vadd.f32 %v1023_v51, %v2049_v3  ;;  %v655_v31 = vrot.slane %v654_v26, 1  ;;  %v645_v51 = vrot.slane %v644_v60, 1 }
 0x481   :  { %1033 = vrot.lane.b32.xlu1 %v1024_v63, %s1713_s12  ;;  %v1365_v0 = vmul.f32 -1.442695, %v1024_v63  ;;  %v656_v35 = vadd.f32 %v655_v31, %v654_v26 }
 0x483   :  { %1677 = vpow2.f32 %v1365_v0  ;;  %v657_v44 = vmul.f32 %v1937_v39, %v656_v35 }
 0x485   :  { %665 = vperm.xlu1 %1617, %v1822_v10   ;;  %v1660_v10 = vld [vmem:[%s2166_s11 + $0x10] sm:$0xff]   ;;  %v658_v52 = vadd.f32 1e-08, %v657_v44 }
 0x489   :  { %1278 = vperm.xlu1 %1617, %v1955_v54   ;;  %v1392_v54 = vld [vmem:[%s2158_s3 + $0x8] sm:$0xff]  ;;  %s1715_s3 = smov [#allocation2]  }
 0x48a   :  { %s1290_s11 = sshll.u32 %s1715_s3, 4  ;;  %s1291_s11 = int_to_ptr.vmem [resolvable:$true] %s1290_s11 }
 0x48b   :  { %s1685_s5 = scalar_lea.vmem %s1291_s11, 128  ;;  %p1690_p1 = scmp.lt.s32.totalorder %s1291_s11, %s1291_s11 }
 0x48c   :  { %p1686_p0 = scmp.ne.s32.totalorder %s1291_s11, %s1685_s5  ;;  %p1691_p2 = scmp.lt.s32.totalorder %s1685_s5, %s1685_s5 }
 0x48e   :  { %p1692_p3 = por %p1691_p2, %p1690_p1 }
 0x490   :  { %v1678_v8 = vpop.eup %1677  ;;  %p1693_p4 = pnand %p1692_p3, %p1686_p0 }
 0x491   :  { %v1028_v56 = vadd.f32 1.0, %v1678_v8 }
 0x493   :  { %1679 = vrcp.f32 %v1028_v56  ;;  %v646_v56 = vadd.f32 %v645_v51, %v644_v60 }
 0x494   :  { %1681 = vrcp.f32 %v658_v52 }
 0x4a0   :  { %v1680_v2 = vpop.eup %1679 }
 0x4a1   :  { %v1031_v1 = vmul.f32 %v1680_v2, %v1024_v63 }
 0x4f3   :  { %v1034_v5 = vpop.permute.xlu1 %1033 }
 0x4f4   :  { %v1036_v9 = vmul.f32 %v1034_v5, %v1031_v1  ;;  %v1682_v1 = vpop.eup %1681  ;;  %v647_v5 = vmul.f32 %v1937_v39, %v646_v56 }
 0x4f6   :  { %v1037_v3 = vpack.c.bf16 %v1036_v9, %v1036_v9 }
 0x4f8   :  { %1573 = vmatmul.mubr.msk.bf16.vlgmr.msra.gmra.mxu1 %vm342_vm4, %v1037_v3  ;;  %1585 = vmatmul.mubr.msk.bf16.vlgmr.msra.gmra.mxu0 %vm342_vm4, %v1037_v3 }
 0x4f9   :  { %1589 = vmatpush3.bf16.msra.mxu1 %v1659_v7  ;;  %1592 = vmatprep.mubr.msk.bf16.mxu1 %vm1710_vm0, %v1709_v4  ;;  %v660_v7 = vmul.f32 %v1682_v1, %v647_v5 }
 0x4fa   :  { %1590 = vmatprep.subr.bf16.mxu1 %v1709_v4 }
 0x4fd   :  { %1591 = vmatpush3.bf16.msra.mxu1 %v1660_v10  ;;  %v661_v10 = vmul.f32 %v660_v7, %v2090_v25 }
 0x5b8   :  { %v2129_v11 = vpop.f32.mrf.mxu1  ;;  %v1181_v12 = vpop.f32.mrf.mxu0 }
 0x5b9   :  { %v1189_v13 = vmul.f32 %v1392_v54, %v1181_v12  ;;  %v1251_v34 = vand.u32 2147483647, %v2129_v11 }
 0x5ba   :  { %v1574_v14 = vpop.f32.mrf.mxu1  ;;  %v1586_v15 = vpop.f32.mrf.mxu0 }
 0x5bb   :  { %v1190_v16 = vpack.c.bf16 %v1189_v13, %v1189_v13  ;;  %v1252_v42 = vmul.f32 %v1251_v34, %v2096_v32  ;;  %v666_v13 = vpop.permute.xlu1 %665  ;;  %v662_v14 = vadd.f32 %v661_v10, %v2017_v40 }
 0x5bc   :  { %v1111_v17 = vpop.f32.mrf.mxu1  ;;  %v1184_v20 = vpop.f32.mrf.mxu0 }
 0x5bd   :  { %1593 = vmatmul.mubr.msk.bf16.vlgmr.msra.gmra.mxu1 %vm67_vm2, %v1190_v16  ;;  %v1253_v50 = vsel %vm67_vm2, %v1252_v42, 0.0  ;;  %v668_v16 = vmul.f32 %v666_v13, %v662_v14 }
 0x5be   :  { %v1575_v4 = vpop.f32.mrf.mxu1  ;;  %v1587_v21 = vpop.f32.mrf.mxu0  ;;  %v1254_v57 = vrot.slane %v1253_v50, 4 }
 0x5bf   :  { %v1279_v4 = vpop.permute.xlu1 %1278  ;;  %v731_v39 = vadd.f32 %v2092_v22, %v668_v16 }
 0x5c0   :  { %v1255_v61 = vadd.f32 %v1254_v57, %v1253_v50 }
 0x5c2   :  { %v1256_v63 = vrot.slane %v1255_v61, 2 }
 0x5c4   :  { %v1257_v2 = vadd.f32 %v1256_v63, %v1255_v61 }
 0x5c6   :  { %v1258_v9 = vrot.slane %v1257_v2, 1 }
 0x5c8   :  { %v1259_v3 = vadd.f32 %v1258_v9, %v1257_v2 }
 0x5ca   :  { %v1260_v54 = vmul.f32 %v2100_v48, %v1259_v3 }
 0x67d   :  { %v1245_v36 = vpop.f32.mrf.mxu1 }
 0x67e   :  { %v1261_v37 = vand.u32 2147483647, %v1245_v36 }
 0x67f   :  { %v1594_v41 = vpop.f32.mrf.mxu1 }
 0x680   :  { %v1262_v43 = vmul.f32 %v1261_v37, %v2096_v32 }
 0x681   :  { %v1248_v45 = vpop.f32.mrf.mxu1 }
 0x682   :  { %v1263_v46 = vsel %vm67_vm2, %v1262_v43, 0.0 }
 0x683   :  { %v1264_v47 = vrot.slane %v1263_v46, 4  ;;  %v1595_v49 = vpop.f32.mrf.mxu1 }
 0x685   :  { %v1265_v53 = vadd.f32 %v1264_v47, %v1263_v46 }
 0x687   :  { %v1266_v58 = vrot.slane %v1265_v53, 2 }
 0x689   :  { %v1267_v59 = vadd.f32 %v1266_v58, %v1265_v53 }
 0x68b   :  { %v1268_v32 = vrot.slane %v1267_v59, 1 }
 0x68d   :  { %v1269_v62 = vadd.f32 %v1268_v32, %v1267_v59 }
 0x68f   :  { %v1270_v0 = vmul.f32 %v2100_v48, %v1269_v62 }
 0x691   :  { %v1271_v8 = vadd.f32 1e-08, %v1270_v0 }
 0x693   :  { %1683 = vrcp.f32 %v1271_v8 }
 0x6a0   :  { %v1684_v12 = vpop.eup %1683 }
 0x6a1   :  { %v1273_v15 = vmul.f32 %v1684_v12, %v1260_v54 }
 0x6a3   :  { %v1274_v17 = vmul.f32 %v1273_v15, %v1245_v36 }
 0x6a5   :  { %v1275_v20 = vadd.f32 %v1274_v17, %v2129_v11 }
 0x6a7   :  { %v1281_v21 = vmul.f32 %v1279_v4, %v1275_v20 }
 0x6a9   :  { %v1282_v27 = vadd.f32 %v1281_v21, %v731_v39 }
 0x6ab   :  { %1283 = vst.msk [vmem:[#allocation2] sm:$0xff] %vm67_vm2, %v1282_v27 }
 0x6ac   :  { %1696 = shalt.err (!%p1693_p4)
}
 0x6ad   :  { %1293 = dma.vmem_to_hbm [thread:$0]  %s1291_s11, 128, %s2169_s14, [#allocation3]  }
 0x6ae   :  { %1705 = dma.done.wait [#allocation3], 128  }
 0x6af   :  { %1706 = vsyncadd [#allocation3], 4294967168 }
 0x6b0   :  { %1297 = vsyncpa [#allocation3], 1 }

</bundles_post_ra>
